<compile_context>
chip_gen: v7x
topology: tpu7x:2x2x1
jax: 0.10.0
libtpu: 0.0.40
codegen_flags: <defaults>
</compile_context>

<pallas_src>
import numpy as np
import jax
import jax.numpy as jnp
from jax.experimental import pallas as pl
from jax.experimental.pallas import tpu as pltpu

# ----------------------------------------------------------------------------
# Config (mirrors Seq2SeqAttrs / args) -- small synthetic sizes
# ----------------------------------------------------------------------------
BATCH = 4
NUM_NODES = 8
INPUT_DIM = 2
HIDDEN_DIM = 16
NUM_LAYERS = 2
MAX_DIFFUSION_STEP = 2                 # args.DCRNN_cheb_k
FILTER_TYPE = "dual_random_walk"       # -> 2 supports
NUM_SUPPORTS = 2
NUM_MATRICES = NUM_SUPPORTS * MAX_DIFFUSION_STEP + 1


# ----------------------------------------------------------------------------
# Fused Pallas kernel: full encoder step (all layers, gates, GRU update)
# ----------------------------------------------------------------------------
def _encoder_kernel(x_ref, h0_ref, cheb_ref, *rest):
    """Inputs (all node-major, batch folded into lanes):
         x_ref    : (N, B*C_in)
         h0_ref   : (L, N, B*H)
         cheb_ref : (M*N, N)        stacked Chebyshev matrices (host constant)
         rest     : 6 refs per layer: wx_ru, wh_ru, wx_c, wh_c, b_ru, b_c
                    then out_ref (N, L*B*H).
    """
    param_refs = rest[:-1]
    out_ref = rest[-1]

    num_layers = h0_ref.shape[0]
    n_nodes = x_ref.shape[0]
    bh = h0_ref.shape[-1]                       # B * H
    num_matrices = cheb_ref.shape[0] // n_nodes

    cheb = cheb_ref[...]                        # (M*N, N), reused by all layers

    def sigmoid(z):
        # exp + approx reciprocal both run on the EUP (frees the VALU).
        return pl.reciprocal(1.0 + jnp.exp(-z), approx=True)

    def gconv(d_a, d_b, wa_ref, wb_ref, bias_ref):
        """sum_m d_a[m-block] @ wa[m] + d_b[m-block] @ wb[m]  (+ bias).

        d_a/d_b are (M*N, B*C) diffusion stacks; wa/wb are batch-block-
        diagonal weights (M, B*C, B*O).  All matmuls are independent
        (no recurrence) and have wide, lane-dense outputs.
        """
        acc = bias_ref[...]                                   # (1, B*O)
        for m in range(num_matrices):
            rows = slice(m * n_nodes, (m + 1) * n_nodes)      # sublane-aligned
            acc = acc + jnp.dot(d_a[rows, :], wa_ref[m],
                                preferred_element_type=jnp.float32)
            acc = acc + jnp.dot(d_b[rows, :], wb_ref[m],
                                preferred_element_type=jnp.float32)
        return acc

    h_outs = []
    x_nm = x_ref[...]                                         # (N, B*C_in)
    for layer in range(num_layers):
        wx_ru, wh_ru, wx_c, wh_c, b_ru, b_c = \
            param_refs[6 * layer: 6 * (layer + 1)]
        h_nm = h0_ref[layer]                                  # (N, B*H)

        # One MXU matmul per diffusion stream; d_x is reused by both gconvs.
        d_x = jnp.dot(cheb, x_nm, preferred_element_type=jnp.float32)
        d_h = jnp.dot(cheb, h_nm, preferred_element_type=jnp.float32)

        # Fused r|u gate: (N, 2*B*H) = full 128-lane-wide output, then two
        # static lane slices (columns ordered [r-block | u-block]).
        ru = sigmoid(gconv(d_x, d_h, wx_ru, wh_ru, b_ru))
        r = ru[:, :bh]                                        # (N, B*H)
        u = ru[:, bh:]                                        # (N, B*H)

        d_rh = jnp.dot(cheb, r * h_nm, preferred_element_type=jnp.float32)
        c = jnp.tanh(gconv(d_x, d_rh, wx_c, wh_c, b_c))       # (N, B*H)

        h_new = u * h_nm + (1.0 - u) * c                      # (N, B*H)
        h_outs.append(h_new)
        x_nm = h_new                                          # feeds next layer

    # Single unmasked 128-lane-wide store: (N, L*B*H) = (8, 128).
    out_ref[...] = jnp.concatenate(h_outs, axis=-1)


def encoder_forward(inputs, layer_blocks, cheb_stack, hidden_state=None):
    """inputs: (B, N*INPUT_DIM) -> (output (B, N*H), hidden (L, B, N*H))."""
    b = inputs.shape[0]
    n, h, in_dim, num_l = NUM_NODES, HIDDEN_DIM, INPUT_DIM, NUM_LAYERS
    if hidden_state is None:
        hidden_state = jnp.zeros((num_l, b, n * h), jnp.float32)

    # Wrapper-side (XLA) relayouts to the kernel's node-major layout.
    x_nm = inputs.reshape(b, n, in_dim).transpose(1, 0, 2).reshape(n, b * in_dim)
    h_nm = hidden_state.reshape(num_l, b, n, h).transpose(0, 2, 1, 3) \
                       .reshape(num_l, n, b * h)

    flat_params = []
    for blk in layer_blocks:
        flat_params += [blk["wx_ru"], blk["wh_ru"], blk["wx_c"], blk["wh_c"],
                        blk["b_ru"], blk["b_c"]]

    vmem = pl.BlockSpec(memory_space=pltpu.MemorySpace.VMEM)
    n_in = 3 + len(flat_params)

    out_nm = pl.pallas_call(
        _encoder_kernel,
        out_shape=jax.ShapeDtypeStruct((n, num_l * b * h), jnp.float32),
        in_specs=[vmem] * n_in,
        out_specs=vmem,
    )(x_nm, h_nm, cheb_stack, *flat_params)

    # Wrapper-side relayout back to the torch (L, B, N*H) layout.
    hid = out_nm.reshape(n, num_l, b, h).transpose(1, 2, 0, 3) \
                .reshape(num_l, b, n * h)
    return hid[-1], hid


# ----------------------------------------------------------------------------
# Host-side precompute: supports, Chebyshev stack, block-diagonal gate weights
# ----------------------------------------------------------------------------
def _random_walk(adj):
    d = adj.sum(axis=1)
    d_inv = np.where(d > 0, 1.0 / d, 0.0)
    return d_inv[:, None] * adj


def build_supports(adj):
    if FILTER_TYPE == "dual_random_walk":
        return [_random_walk(adj).T.copy(), _random_walk(adj.T).T.copy()]
    elif FILTER_TYPE == "random_walk":
        return [_random_walk(adj).T.copy()]
    raise NotImplementedError(FILTER_TYPE)


def build_cheb_stack(supports, cheb_k):
    """Stack [I, T1(S1), ..., Tk(S1), T1(S2), ...] into one (M*N, N) operand."""
    n = supports[0].shape[0]
    eye = np.eye(n, dtype=np.float32)
    mats = [eye]
    for s in supports:
        s = np.asarray(s, np.float32)
        t_km1, t_km2 = s.copy(), eye
        mats.append(t_km1)
        for _ in range(2, cheb_k + 1):
            t_k = 2.0 * (s @ t_km1) - t_km2
            mats.append(t_k)
            t_km1, t_km2 = t_k, t_km1
    stack = np.concatenate(mats, axis=0)
    assert stack.shape == (NUM_MATRICES * n, n)
    return jnp.asarray(stack)


def build_layer_blocks(params, in_dim, batch):
    """Per-layer, per-matrix batch-block-diagonal gate weights kron(I_B, W_m).

    Output columns of the r/u weights are reordered to [r-block | u-block],
    each block batch-major / channel-minor, so the kernel splits r and u with
    two static lane slices and r lands directly in the hidden-state layout.
    """
    hdim, m_tot = HIDDEN_DIM, NUM_MATRICES
    w_ru = np.asarray(params["w_ru_full"], np.float32)   # (c_dim*M, 2H)
    w_c = np.asarray(params["w_c_full"], np.float32)     # (c_dim*M, H)
    b_ru = np.asarray(params["b_ru"], np.float32).reshape(-1)   # (2H,)
    b_c = np.asarray(params["b_c"], np.float32).reshape(-1)     # (H,)
    eye_b = np.eye(batch, dtype=np.float32)

    def blk(w_small):
        return np.kron(eye_b, w_small)

    wx_ru, wh_ru, wx_c, wh_c = [], [], [], []
    for m in range(m_tot):
        w_x_m = w_ru[np.arange(in_dim) * m_tot + m, :]              # (Cin, 2H)
        w_h_m = w_ru[(in_dim + np.arange(hdim)) * m_tot + m, :]     # (H, 2H)
        wx_ru.append(np.concatenate([blk(w_x_m[:, :hdim]),
                                     blk(w_x_m[:, hdim:])], axis=1))
        wh_ru.append(np.concatenate([blk(w_h_m[:, :hdim]),
                                     blk(w_h_m[:, hdim:])], axis=1))
        wc_x_m = w_c[np.arange(in_dim) * m_tot + m, :]              # (Cin, H)
        wc_h_m = w_c[(in_dim + np.arange(hdim)) * m_tot + m, :]     # (H, H)
        wx_c.append(blk(wc_x_m))
        wh_c.append(blk(wc_h_m))

    b_ru_blk = np.concatenate([np.tile(b_ru[:hdim], batch),
                               np.tile(b_ru[hdim:], batch)])[None, :]
    b_c_blk = np.tile(b_c, batch)[None, :]
    return {
        "wx_ru": jnp.asarray(np.stack(wx_ru)),   # (M, B*Cin, 2*B*H)
        "wh_ru": jnp.asarray(np.stack(wh_ru)),   # (M, B*H,   2*B*H)
        "wx_c": jnp.asarray(np.stack(wx_c)),     # (M, B*Cin, B*H)
        "wh_c": jnp.asarray(np.stack(wh_c)),     # (M, B*H,   B*H)
        "b_ru": jnp.asarray(b_ru_blk, jnp.float32),   # (1, 2*B*H)
        "b_c": jnp.asarray(b_c_blk, jnp.float32),     # (1, B*H)
    }


def init_layer_params(key, in_dim):
    """torch-layout DCGRUCell parameters (row index = channel*M + m)."""
    c = in_dim + HIDDEN_DIM
    k1, k2 = jax.random.split(key)

    def xavier(k, shape):
        std = np.sqrt(2.0 / (shape[0] + shape[1]))
        return (std * jax.random.normal(k, shape)).astype(jnp.float32)

    w_ru_full = xavier(k1, (c * NUM_MATRICES, 2 * HIDDEN_DIM))
    w_c_full = xavier(k2, (c * NUM_MATRICES, HIDDEN_DIM))
    b_ru = jnp.full((1, 2 * HIDDEN_DIM), 1.0, jnp.float32)   # bias_start=1.0
    b_c = jnp.zeros((1, HIDDEN_DIM), jnp.float32)
    return {"w_ru_full": w_ru_full, "w_c_full": w_c_full,
            "b_ru": b_ru, "b_c": b_c}


# ----------------------------------------------------------------------------
# Pure-JAX reference (mirrors the PyTorch DCGRUCell._gconv exactly)
# ----------------------------------------------------------------------------
def _ref_gconv(inputs, state, supports, w_full, bias, out_dim):
    b = inputs.shape[0]
    x_in = inputs.reshape(b, NUM_NODES, -1)
    st = state.reshape(b, NUM_NODES, -1)
    xs = jnp.concatenate([x_in, st], axis=2)
    c_dim = xs.shape[2]
    x0 = xs.transpose(1, 2, 0).reshape(NUM_NODES, c_dim * b)
    x = x0[None]
    for s in supports:
        x1 = s @ x0
        x = jnp.concatenate([x, x1[None]], axis=0)
        xk_1, xk_2 = x1, x0
        for _ in range(2, MAX_DIFFUSION_STEP + 1):
            x2 = 2.0 * (s @ xk_1) - xk_2
            x = jnp.concatenate([x, x2[None]], axis=0)
            xk_1, xk_2 = x2, xk_1
    x = x.reshape(NUM_MATRICES, NUM_NODES, c_dim, b).transpose(3, 1, 2, 0)
    x = x.reshape(b * NUM_NODES, c_dim * NUM_MATRICES)
    return (x @ w_full + bias).reshape(b, NUM_NODES * out_dim)


def _ref_cell(inputs, hx, supports, p):
    value = jax.nn.sigmoid(_ref_gconv(inputs, hx, supports,
                                      p["w_ru_full"], p["b_ru"], 2 * HIDDEN_DIM))
    value = value.reshape(-1, NUM_NODES, 2 * HIDDEN_DIM)
    r = value[..., :HIDDEN_DIM].reshape(-1, NUM_NODES * HIDDEN_DIM)
    u = value[..., HIDDEN_DIM:].reshape(-1, NUM_NODES * HIDDEN_DIM)
    c = jnp.tanh(_ref_gconv(inputs, r * hx, supports,
                            p["w_c_full"], p["b_c"], HIDDEN_DIM))
    return u * hx + (1.0 - u) * c


def ref_encoder(inputs, layer_params, supports, hidden_state=None):
    b = inputs.shape[0]
    if hidden_state is None:
        hidden_state = jnp.zeros((NUM_LAYERS, b, NUM_NODES * HIDDEN_DIM),
                                 jnp.float32)
    hidden_states, output = [], inputs
    for l in range(NUM_LAYERS):
        new_h = _ref_cell(output, hidden_state[l], supports, layer_params[l])
        hidden_states.append(new_h)
        output = new_h
    return output, jnp.stack(hidden_states)


# ----------------------------------------------------------------------------
if __name__ == "__main__":
    key = jax.random.PRNGKey(0)
    k_adj, k_in, k_h, k_l0, k_l1 = jax.random.split(key, 5)

    # Deterministic synthetic adjacency (dense stand-in for adj_mx).
    adj = np.array(jax.random.uniform(k_adj, (NUM_NODES, NUM_NODES)),
                   dtype=np.float32)
    np.fill_diagonal(adj, 1.0)
    supports_np = build_supports(adj)
    supports_j = [jnp.asarray(s, jnp.float32) for s in supports_np]

    layer_keys = [k_l0, k_l1]
    layer_params = [init_layer_params(layer_keys[l],
                                      INPUT_DIM if l == 0 else HIDDEN_DIM)
                    for l in range(NUM_LAYERS)]

    # Host-side precompute for the kernel.
    cheb_stack = build_cheb_stack(supports_np, MAX_DIFFUSION_STEP)
    layer_blocks = [build_layer_blocks(layer_params[l],
                                       INPUT_DIM if l == 0 else HIDDEN_DIM,
                                       BATCH)
                    for l in range(NUM_LAYERS)]

    inputs = jax.random.normal(k_in, (BATCH, NUM_NODES * INPUT_DIM),
                               dtype=jnp.float32)
    hidden0 = 0.1 * jax.random.normal(
        k_h, (NUM_LAYERS, BATCH, NUM_NODES * HIDDEN_DIM), dtype=jnp.float32)

    out, hid = encoder_forward(inputs, layer_blocks, cheb_stack, hidden0)
    out = jax.block_until_ready(out)
    hid = jax.block_until_ready(hid)

    assert out.shape == (BATCH, NUM_NODES * HIDDEN_DIM)
    assert hid.shape == (NUM_LAYERS, BATCH, NUM_NODES * HIDDEN_DIM)

    # Cross-check against a torch-faithful pure-JAX reference.
    ref_out, ref_hid = ref_encoder(inputs, layer_params, supports_j, hidden0)
    if not (jnp.allclose(out, ref_out, atol=1e-2, rtol=1e-2) and
            jnp.allclose(hid, ref_hid, atol=1e-2, rtol=1e-2)):
        raise AssertionError("Pallas kernel does not match reference")

    print("KERNEL_OK")
</pallas_src>

<mosaic_0001>
module attributes {stable_mosaic.version = 11 : i64} {
  func.func @_encoder_kernel(%arg0: memref<8x8xf32, #tpu.memory_space<vmem>>, %arg1: memref<2x8x64xf32, #tpu.memory_space<vmem>>, %arg2: memref<40x8xf32, #tpu.memory_space<vmem>>, %arg3: memref<5x8x128xf32, #tpu.memory_space<vmem>>, %arg4: memref<5x64x128xf32, #tpu.memory_space<vmem>>, %arg5: memref<5x8x64xf32, #tpu.memory_space<vmem>>, %arg6: memref<5x64x64xf32, #tpu.memory_space<vmem>>, %arg7: memref<1x128xf32, #tpu.memory_space<vmem>>, %arg8: memref<1x64xf32, #tpu.memory_space<vmem>>, %arg9: memref<5x64x128xf32, #tpu.memory_space<vmem>>, %arg10: memref<5x64x128xf32, #tpu.memory_space<vmem>>, %arg11: memref<5x64x64xf32, #tpu.memory_space<vmem>>, %arg12: memref<5x64x64xf32, #tpu.memory_space<vmem>>, %arg13: memref<1x128xf32, #tpu.memory_space<vmem>>, %arg14: memref<1x64xf32, #tpu.memory_space<vmem>>, %arg15: memref<8x128xf32, #tpu.memory_space<vmem>>) attributes {dimension_semantics = [], scalar_prefetch = 0 : i64, scratch_operands = 0 : i64, tpu.core_type = #tpu.core_type<tc>} {
    %c0 = arith.constant 0 : index
    %c0_0 = arith.constant 0 : index
    %0 = vector.load %arg2[%c0, %c0_0] : memref<40x8xf32, #tpu.memory_space<vmem>>, vector<40x8xf32>
    %c0_1 = arith.constant 0 : index
    %c0_2 = arith.constant 0 : index
    %1 = vector.load %arg0[%c0_1, %c0_2] : memref<8x8xf32, #tpu.memory_space<vmem>>, vector<8x8xf32>
    %c0_3 = arith.constant 0 : index
    %c0_4 = arith.constant 0 : index
    %c0_5 = arith.constant 0 : index
    %2 = vector.load %arg1[%c0_3, %c0_4, %c0_5] : memref<2x8x64xf32, #tpu.memory_space<vmem>>, vector<1x8x64xf32>
    %3 = vector.shape_cast %2 : vector<1x8x64xf32> to vector<8x64xf32>
    %cst = arith.constant dense<0.000000e+00> : vector<40x8xf32>
    %4 = tpu.matmul %0, %1, %cst {dimension_numbers = #tpu.dot_dimension_numbers<[1], [0], [0], [1], [0, 0, 1, 1], [], []>} : vector<40x8xf32>, vector<8x8xf32>, vector<40x8xf32> -> vector<40x8xf32>
    %cst_6 = arith.constant dense<0.000000e+00> : vector<40x64xf32>
    %5 = tpu.matmul %0, %3, %cst_6 {dimension_numbers = #tpu.dot_dimension_numbers<[1], [0], [0], [1], [0, 0, 1, 1], [], []>} : vector<40x8xf32>, vector<8x64xf32>, vector<40x64xf32> -> vector<40x64xf32>
    %c0_7 = arith.constant 0 : index
    %c0_8 = arith.constant 0 : index
    %6 = vector.load %arg7[%c0_7, %c0_8] : memref<1x128xf32, #tpu.memory_space<vmem>>, vector<1x128xf32>
    %7 = vector.extract_strided_slice %4 {offsets = [0, 0], sizes = [8, 8], strides = [1, 1]} : vector<40x8xf32> to vector<8x8xf32>
    %c0_9 = arith.constant 0 : index
    %c0_10 = arith.constant 0 : index
    %c0_11 = arith.constant 0 : index
    %8 = vector.load %arg3[%c0_9, %c0_10, %c0_11] : memref<5x8x128xf32, #tpu.memory_space<vmem>>, vector<1x8x128xf32>
    %9 = vector.shape_cast %8 : vector<1x8x128xf32> to vector<8x128xf32>
    %cst_12 = arith.constant dense<0.000000e+00> : vector<8x128xf32>
    %10 = tpu.matmul %7, %9, %cst_12 {dimension_numbers = #tpu.dot_dimension_numbers<[1], [0], [0], [1], [0, 0, 1, 1], [], []>} : vector<8x8xf32>, vector<8x128xf32>, vector<8x128xf32> -> vector<8x128xf32>
    %11 = vector.broadcast %6 : vector<1x128xf32> to vector<8x128xf32>
    %12 = arith.addf %11, %10 : vector<8x128xf32>
    %13 = vector.extract_strided_slice %5 {offsets = [0, 0], sizes = [8, 64], strides = [1, 1]} : vector<40x64xf32> to vector<8x64xf32>
    %c0_13 = arith.constant 0 : index
    %c0_14 = arith.constant 0 : index
    %c0_15 = arith.constant 0 : index
    %14 = vector.load %arg4[%c0_13, %c0_14, %c0_15] : memref<5x64x128xf32, #tpu.memory_space<vmem>>, vector<1x64x128xf32>
    %15 = vector.shape_cast %14 : vector<1x64x128xf32> to vector<64x128xf32>
    %cst_16 = arith.constant dense<0.000000e+00> : vector<8x128xf32>
    %16 = tpu.matmul %13, %15, %cst_16 {dimension_numbers = #tpu.dot_dimension_numbers<[1], [0], [0], [1], [0, 0, 1, 1], [], []>} : vector<8x64xf32>, vector<64x128xf32>, vector<8x128xf32> -> vector<8x128xf32>
    %17 = arith.addf %12, %16 : vector<8x128xf32>
    %18 = vector.extract_strided_slice %4 {offsets = [8, 0], sizes = [8, 8], strides = [1, 1]} : vector<40x8xf32> to vector<8x8xf32>
    %c1 = arith.constant 1 : index
    %c0_17 = arith.constant 0 : index
    %c0_18 = arith.constant 0 : index
    %19 = vector.load %arg3[%c1, %c0_17, %c0_18] : memref<5x8x128xf32, #tpu.memory_space<vmem>>, vector<1x8x128xf32>
    %20 = vector.shape_cast %19 : vector<1x8x128xf32> to vector<8x128xf32>
    %cst_19 = arith.constant dense<0.000000e+00> : vector<8x128xf32>
    %21 = tpu.matmul %18, %20, %cst_19 {dimension_numbers = #tpu.dot_dimension_numbers<[1], [0], [0], [1], [0, 0, 1, 1], [], []>} : vector<8x8xf32>, vector<8x128xf32>, vector<8x128xf32> -> vector<8x128xf32>
    %22 = arith.addf %17, %21 : vector<8x128xf32>
    %23 = vector.extract_strided_slice %5 {offsets = [8, 0], sizes = [8, 64], strides = [1, 1]} : vector<40x64xf32> to vector<8x64xf32>
    %c1_20 = arith.constant 1 : index
    %c0_21 = arith.constant 0 : index
    %c0_22 = arith.constant 0 : index
    %24 = vector.load %arg4[%c1_20, %c0_21, %c0_22] : memref<5x64x128xf32, #tpu.memory_space<vmem>>, vector<1x64x128xf32>
    %25 = vector.shape_cast %24 : vector<1x64x128xf32> to vector<64x128xf32>
    %cst_23 = arith.constant dense<0.000000e+00> : vector<8x128xf32>
    %26 = tpu.matmul %23, %25, %cst_23 {dimension_numbers = #tpu.dot_dimension_numbers<[1], [0], [0], [1], [0, 0, 1, 1], [], []>} : vector<8x64xf32>, vector<64x128xf32>, vector<8x128xf32> -> vector<8x128xf32>
    %27 = arith.addf %22, %26 : vector<8x128xf32>
    %28 = vector.extract_strided_slice %4 {offsets = [16, 0], sizes = [8, 8], strides = [1, 1]} : vector<40x8xf32> to vector<8x8xf32>
    %c2 = arith.constant 2 : index
    %c0_24 = arith.constant 0 : index
    %c0_25 = arith.constant 0 : index
    %29 = vector.load %arg3[%c2, %c0_24, %c0_25] : memref<5x8x128xf32, #tpu.memory_space<vmem>>, vector<1x8x128xf32>
    %30 = vector.shape_cast %29 : vector<1x8x128xf32> to vector<8x128xf32>
    %cst_26 = arith.constant dense<0.000000e+00> : vector<8x128xf32>
    %31 = tpu.matmul %28, %30, %cst_26 {dimension_numbers = #tpu.dot_dimension_numbers<[1], [0], [0], [1], [0, 0, 1, 1], [], []>} : vector<8x8xf32>, vector<8x128xf32>, vector<8x128xf32> -> vector<8x128xf32>
    %32 = arith.addf %27, %31 : vector<8x128xf32>
    %33 = vector.extract_strided_slice %5 {offsets = [16, 0], sizes = [8, 64], strides = [1, 1]} : vector<40x64xf32> to vector<8x64xf32>
    %c2_27 = arith.constant 2 : index
    %c0_28 = arith.constant 0 : index
    %c0_29 = arith.constant 0 : index
    %34 = vector.load %arg4[%c2_27, %c0_28, %c0_29] : memref<5x64x128xf32, #tpu.memory_space<vmem>>, vector<1x64x128xf32>
    %35 = vector.shape_cast %34 : vector<1x64x128xf32> to vector<64x128xf32>
    %cst_30 = arith.constant dense<0.000000e+00> : vector<8x128xf32>
    %36 = tpu.matmul %33, %35, %cst_30 {dimension_numbers = #tpu.dot_dimension_numbers<[1], [0], [0], [1], [0, 0, 1, 1], [], []>} : vector<8x64xf32>, vector<64x128xf32>, vector<8x128xf32> -> vector<8x128xf32>
    %37 = arith.addf %32, %36 : vector<8x128xf32>
    %38 = vector.extract_strided_slice %4 {offsets = [24, 0], sizes = [8, 8], strides = [1, 1]} : vector<40x8xf32> to vector<8x8xf32>
    %c3 = arith.constant 3 : index
    %c0_31 = arith.constant 0 : index
    %c0_32 = arith.constant 0 : index
    %39 = vector.load %arg3[%c3, %c0_31, %c0_32] : memref<5x8x128xf32, #tpu.memory_space<vmem>>, vector<1x8x128xf32>
    %40 = vector.shape_cast %39 : vector<1x8x128xf32> to vector<8x128xf32>
    %cst_33 = arith.constant dense<0.000000e+00> : vector<8x128xf32>
    %41 = tpu.matmul %38, %40, %cst_33 {dimension_numbers = #tpu.dot_dimension_numbers<[1], [0], [0], [1], [0, 0, 1, 1], [], []>} : vector<8x8xf32>, vector<8x128xf32>, vector<8x128xf32> -> vector<8x128xf32>
    %42 = arith.addf %37, %41 : vector<8x128xf32>
    %43 = vector.extract_strided_slice %5 {offsets = [24, 0], sizes = [8, 64], strides = [1, 1]} : vector<40x64xf32> to vector<8x64xf32>
    %c3_34 = arith.constant 3 : index
    %c0_35 = arith.constant 0 : index
    %c0_36 = arith.constant 0 : index
    %44 = vector.load %arg4[%c3_34, %c0_35, %c0_36] : memref<5x64x128xf32, #tpu.memory_space<vmem>>, vector<1x64x128xf32>
    %45 = vector.shape_cast %44 : vector<1x64x128xf32> to vector<64x128xf32>
    %cst_37 = arith.constant dense<0.000000e+00> : vector<8x128xf32>
    %46 = tpu.matmul %43, %45, %cst_37 {dimension_numbers = #tpu.dot_dimension_numbers<[1], [0], [0], [1], [0, 0, 1, 1], [], []>} : vector<8x64xf32>, vector<64x128xf32>, vector<8x128xf32> -> vector<8x128xf32>
    %47 = arith.addf %42, %46 : vector<8x128xf32>
    %48 = vector.extract_strided_slice %4 {offsets = [32, 0], sizes = [8, 8], strides = [1, 1]} : vector<40x8xf32> to vector<8x8xf32>
    %c4 = arith.constant 4 : index
    %c0_38 = arith.constant 0 : index
    %c0_39 = arith.constant 0 : index
    %49 = vector.load %arg3[%c4, %c0_38, %c0_39] : memref<5x8x128xf32, #tpu.memory_space<vmem>>, vector<1x8x128xf32>
    %50 = vector.shape_cast %49 : vector<1x8x128xf32> to vector<8x128xf32>
    %cst_40 = arith.constant dense<0.000000e+00> : vector<8x128xf32>
    %51 = tpu.matmul %48, %50, %cst_40 {dimension_numbers = #tpu.dot_dimension_numbers<[1], [0], [0], [1], [0, 0, 1, 1], [], []>} : vector<8x8xf32>, vector<8x128xf32>, vector<8x128xf32> -> vector<8x128xf32>
    %52 = arith.addf %47, %51 : vector<8x128xf32>
    %53 = vector.extract_strided_slice %5 {offsets = [32, 0], sizes = [8, 64], strides = [1, 1]} : vector<40x64xf32> to vector<8x64xf32>
    %c4_41 = arith.constant 4 : index
    %c0_42 = arith.constant 0 : index
    %c0_43 = arith.constant 0 : index
    %54 = vector.load %arg4[%c4_41, %c0_42, %c0_43] : memref<5x64x128xf32, #tpu.memory_space<vmem>>, vector<1x64x128xf32>
    %55 = vector.shape_cast %54 : vector<1x64x128xf32> to vector<64x128xf32>
    %cst_44 = arith.constant dense<0.000000e+00> : vector<8x128xf32>
    %56 = tpu.matmul %53, %55, %cst_44 {dimension_numbers = #tpu.dot_dimension_numbers<[1], [0], [0], [1], [0, 0, 1, 1], [], []>} : vector<8x64xf32>, vector<64x128xf32>, vector<8x128xf32> -> vector<8x128xf32>
    %57 = arith.addf %52, %56 : vector<8x128xf32>
    %cst_45 = arith.constant 0.000000e+00 : f32
    %58 = vector.broadcast %cst_45 : f32 to vector<8x128xf32>
    %59 = arith.subf %58, %57 : vector<8x128xf32>
    %60 = math.exp %59 : vector<8x128xf32>
    %cst_46 = arith.constant 1.000000e+00 : f32
    %61 = vector.broadcast %cst_46 : f32 to vector<8x128xf32>
    %62 = arith.addf %61, %60 : vector<8x128xf32>
    %63 = tpu.reciprocal %62 {approx = true} : vector<8x128xf32> -> vector<8x128xf32>
    %64 = vector.extract_strided_slice %63 {offsets = [0, 0], sizes = [8, 64], strides = [1, 1]} : vector<8x128xf32> to vector<8x64xf32>
    %65 = vector.extract_strided_slice %63 {offsets = [0, 64], sizes = [8, 64], strides = [1, 1]} : vector<8x128xf32> to vector<8x64xf32>
    %66 = arith.mulf %64, %3 : vector<8x64xf32>
    %cst_47 = arith.constant dense<0.000000e+00> : vector<40x64xf32>
    %67 = tpu.matmul %0, %66, %cst_47 {dimension_numbers = #tpu.dot_dimension_numbers<[1], [0], [0], [1], [0, 0, 1, 1], [], []>} : vector<40x8xf32>, vector<8x64xf32>, vector<40x64xf32> -> vector<40x64xf32>
    %c0_48 = arith.constant 0 : index
    %c0_49 = arith.constant 0 : index
    %68 = vector.load %arg8[%c0_48, %c0_49] : memref<1x64xf32, #tpu.memory_space<vmem>>, vector<1x64xf32>
    %69 = vector.extract_strided_slice %4 {offsets = [0, 0], sizes = [8, 8], strides = [1, 1]} : vector<40x8xf32> to vector<8x8xf32>
    %c0_50 = arith.constant 0 : index
    %c0_51 = arith.constant 0 : index
    %c0_52 = arith.constant 0 : index
    %70 = vector.load %arg5[%c0_50, %c0_51, %c0_52] : memref<5x8x64xf32, #tpu.memory_space<vmem>>, vector<1x8x64xf32>
    %71 = vector.shape_cast %70 : vector<1x8x64xf32> to vector<8x64xf32>
    %cst_53 = arith.constant dense<0.000000e+00> : vector<8x64xf32>
    %72 = tpu.matmul %69, %71, %cst_53 {dimension_numbers = #tpu.dot_dimension_numbers<[1], [0], [0], [1], [0, 0, 1, 1], [], []>} : vector<8x8xf32>, vector<8x64xf32>, vector<8x64xf32> -> vector<8x64xf32>
    %73 = vector.broadcast %68 : vector<1x64xf32> to vector<8x64xf32>
    %74 = arith.addf %73, %72 : vector<8x64xf32>
    %75 = vector.extract_strided_slice %67 {offsets = [0, 0], sizes = [8, 64], strides = [1, 1]} : vector<40x64xf32> to vector<8x64xf32>
    %c0_54 = arith.constant 0 : index
    %c0_55 = arith.constant 0 : index
    %c0_56 = arith.constant 0 : index
    %76 = vector.load %arg6[%c0_54, %c0_55, %c0_56] : memref<5x64x64xf32, #tpu.memory_space<vmem>>, vector<1x64x64xf32>
    %77 = vector.shape_cast %76 : vector<1x64x64xf32> to vector<64x64xf32>
    %cst_57 = arith.constant dense<0.000000e+00> : vector<8x64xf32>
    %78 = tpu.matmul %75, %77, %cst_57 {dimension_numbers = #tpu.dot_dimension_numbers<[1], [0], [0], [1], [0, 0, 1, 1], [], []>} : vector<8x64xf32>, vector<64x64xf32>, vector<8x64xf32> -> vector<8x64xf32>
    %79 = arith.addf %74, %78 : vector<8x64xf32>
    %80 = vector.extract_strided_slice %4 {offsets = [8, 0], sizes = [8, 8], strides = [1, 1]} : vector<40x8xf32> to vector<8x8xf32>
    %c1_58 = arith.constant 1 : index
    %c0_59 = arith.constant 0 : index
    %c0_60 = arith.constant 0 : index
    %81 = vector.load %arg5[%c1_58, %c0_59, %c0_60] : memref<5x8x64xf32, #tpu.memory_space<vmem>>, vector<1x8x64xf32>
    %82 = vector.shape_cast %81 : vector<1x8x64xf32> to vector<8x64xf32>
    %cst_61 = arith.constant dense<0.000000e+00> : vector<8x64xf32>
    %83 = tpu.matmul %80, %82, %cst_61 {dimension_numbers = #tpu.dot_dimension_numbers<[1], [0], [0], [1], [0, 0, 1, 1], [], []>} : vector<8x8xf32>, vector<8x64xf32>, vector<8x64xf32> -> vector<8x64xf32>
    %84 = arith.addf %79, %83 : vector<8x64xf32>
    %85 = vector.extract_strided_slice %67 {offsets = [8, 0], sizes = [8, 64], strides = [1, 1]} : vector<40x64xf32> to vector<8x64xf32>
    %c1_62 = arith.constant 1 : index
    %c0_63 = arith.constant 0 : index
    %c0_64 = arith.constant 0 : index
    %86 = vector.load %arg6[%c1_62, %c0_63, %c0_64] : memref<5x64x64xf32, #tpu.memory_space<vmem>>, vector<1x64x64xf32>
    %87 = vector.shape_cast %86 : vector<1x64x64xf32> to vector<64x64xf32>
    %cst_65 = arith.constant dense<0.000000e+00> : vector<8x64xf32>
    %88 = tpu.matmul %85, %87, %cst_65 {dimension_numbers = #tpu.dot_dimension_numbers<[1], [0], [0], [1], [0, 0, 1, 1], [], []>} : vector<8x64xf32>, vector<64x64xf32>, vector<8x64xf32> -> vector<8x64xf32>
    %89 = arith.addf %84, %88 : vector<8x64xf32>
    %90 = vector.extract_strided_slice %4 {offsets = [16, 0], sizes = [8, 8], strides = [1, 1]} : vector<40x8xf32> to vector<8x8xf32>
    %c2_66 = arith.constant 2 : index
    %c0_67 = arith.constant 0 : index
    %c0_68 = arith.constant 0 : index
    %91 = vector.load %arg5[%c2_66, %c0_67, %c0_68] : memref<5x8x64xf32, #tpu.memory_space<vmem>>, vector<1x8x64xf32>
    %92 = vector.shape_cast %91 : vector<1x8x64xf32> to vector<8x64xf32>
    %cst_69 = arith.constant dense<0.000000e+00> : vector<8x64xf32>
    %93 = tpu.matmul %90, %92, %cst_69 {dimension_numbers = #tpu.dot_dimension_numbers<[1], [0], [0], [1], [0, 0, 1, 1], [], []>} : vector<8x8xf32>, vector<8x64xf32>, vector<8x64xf32> -> vector<8x64xf32>
    %94 = arith.addf %89, %93 : vector<8x64xf32>
    %95 = vector.extract_strided_slice %67 {offsets = [16, 0], sizes = [8, 64], strides = [1, 1]} : vector<40x64xf32> to vector<8x64xf32>
    %c2_70 = arith.constant 2 : index
    %c0_71 = arith.constant 0 : index
    %c0_72 = arith.constant 0 : index
    %96 = vector.load %arg6[%c2_70, %c0_71, %c0_72] : memref<5x64x64xf32, #tpu.memory_space<vmem>>, vector<1x64x64xf32>
    %97 = vector.shape_cast %96 : vector<1x64x64xf32> to vector<64x64xf32>
    %cst_73 = arith.constant dense<0.000000e+00> : vector<8x64xf32>
    %98 = tpu.matmul %95, %97, %cst_73 {dimension_numbers = #tpu.dot_dimension_numbers<[1], [0], [0], [1], [0, 0, 1, 1], [], []>} : vector<8x64xf32>, vector<64x64xf32>, vector<8x64xf32> -> vector<8x64xf32>
    %99 = arith.addf %94, %98 : vector<8x64xf32>
    %100 = vector.extract_strided_slice %4 {offsets = [24, 0], sizes = [8, 8], strides = [1, 1]} : vector<40x8xf32> to vector<8x8xf32>
    %c3_74 = arith.constant 3 : index
    %c0_75 = arith.constant 0 : index
    %c0_76 = arith.constant 0 : index
    %101 = vector.load %arg5[%c3_74, %c0_75, %c0_76] : memref<5x8x64xf32, #tpu.memory_space<vmem>>, vector<1x8x64xf32>
    %102 = vector.shape_cast %101 : vector<1x8x64xf32> to vector<8x64xf32>
    %cst_77 = arith.constant dense<0.000000e+00> : vector<8x64xf32>
    %103 = tpu.matmul %100, %102, %cst_77 {dimension_numbers = #tpu.dot_dimension_numbers<[1], [0], [0], [1], [0, 0, 1, 1], [], []>} : vector<8x8xf32>, vector<8x64xf32>, vector<8x64xf32> -> vector<8x64xf32>
    %104 = arith.addf %99, %103 : vector<8x64xf32>
    %105 = vector.extract_strided_slice %67 {offsets = [24, 0], sizes = [8, 64], strides = [1, 1]} : vector<40x64xf32> to vector<8x64xf32>
    %c3_78 = arith.constant 3 : index
    %c0_79 = arith.constant 0 : index
    %c0_80 = arith.constant 0 : index
    %106 = vector.load %arg6[%c3_78, %c0_79, %c0_80] : memref<5x64x64xf32, #tpu.memory_space<vmem>>, vector<1x64x64xf32>
    %107 = vector.shape_cast %106 : vector<1x64x64xf32> to vector<64x64xf32>
    %cst_81 = arith.constant dense<0.000000e+00> : vector<8x64xf32>
    %108 = tpu.matmul %105, %107, %cst_81 {dimension_numbers = #tpu.dot_dimension_numbers<[1], [0], [0], [1], [0, 0, 1, 1], [], []>} : vector<8x64xf32>, vector<64x64xf32>, vector<8x64xf32> -> vector<8x64xf32>
    %109 = arith.addf %104, %108 : vector<8x64xf32>
    %110 = vector.extract_strided_slice %4 {offsets = [32, 0], sizes = [8, 8], strides = [1, 1]} : vector<40x8xf32> to vector<8x8xf32>
    %c4_82 = arith.constant 4 : index
    %c0_83 = arith.constant 0 : index
    %c0_84 = arith.constant 0 : index
    %111 = vector.load %arg5[%c4_82, %c0_83, %c0_84] : memref<5x8x64xf32, #tpu.memory_space<vmem>>, vector<1x8x64xf32>
    %112 = vector.shape_cast %111 : vector<1x8x64xf32> to vector<8x64xf32>
    %cst_85 = arith.constant dense<0.000000e+00> : vector<8x64xf32>
    %113 = tpu.matmul %110, %112, %cst_85 {dimension_numbers = #tpu.dot_dimension_numbers<[1], [0], [0], [1], [0, 0, 1, 1], [], []>} : vector<8x8xf32>, vector<8x64xf32>, vector<8x64xf32> -> vector<8x64xf32>
    %114 = arith.addf %109, %113 : vector<8x64xf32>
    %115 = vector.extract_strided_slice %67 {offsets = [32, 0], sizes = [8, 64], strides = [1, 1]} : vector<40x64xf32> to vector<8x64xf32>
    %c4_86 = arith.constant 4 : index
    %c0_87 = arith.constant 0 : index
    %c0_88 = arith.constant 0 : index
    %116 = vector.load %arg6[%c4_86, %c0_87, %c0_88] : memref<5x64x64xf32, #tpu.memory_space<vmem>>, vector<1x64x64xf32>
    %117 = vector.shape_cast %116 : vector<1x64x64xf32> to vector<64x64xf32>
    %cst_89 = arith.constant dense<0.000000e+00> : vector<8x64xf32>
    %118 = tpu.matmul %115, %117, %cst_89 {dimension_numbers = #tpu.dot_dimension_numbers<[1], [0], [0], [1], [0, 0, 1, 1], [], []>} : vector<8x64xf32>, vector<64x64xf32>, vector<8x64xf32> -> vector<8x64xf32>
    %119 = arith.addf %114, %118 : vector<8x64xf32>
    %120 = math.tanh %119 : vector<8x64xf32>
    %121 = arith.mulf %65, %3 : vector<8x64xf32>
    %cst_90 = arith.constant 1.000000e+00 : f32
    %122 = vector.broadcast %cst_90 : f32 to vector<8x64xf32>
    %123 = arith.subf %122, %65 : vector<8x64xf32>
    %124 = arith.mulf %123, %120 : vector<8x64xf32>
    %125 = arith.addf %121, %124 : vector<8x64xf32>
    %c1_91 = arith.constant 1 : index
    %c0_92 = arith.constant 0 : index
    %c0_93 = arith.constant 0 : index
    %126 = vector.load %arg1[%c1_91, %c0_92, %c0_93] : memref<2x8x64xf32, #tpu.memory_space<vmem>>, vector<1x8x64xf32>
    %127 = vector.shape_cast %126 : vector<1x8x64xf32> to vector<8x64xf32>
    %cst_94 = arith.constant dense<0.000000e+00> : vector<40x64xf32>
    %128 = tpu.matmul %0, %125, %cst_94 {dimension_numbers = #tpu.dot_dimension_numbers<[1], [0], [0], [1], [0, 0, 1, 1], [], []>} : vector<40x8xf32>, vector<8x64xf32>, vector<40x64xf32> -> vector<40x64xf32>
    %cst_95 = arith.constant dense<0.000000e+00> : vector<40x64xf32>
    %129 = tpu.matmul %0, %127, %cst_95 {dimension_numbers = #tpu.dot_dimension_numbers<[1], [0], [0], [1], [0, 0, 1, 1], [], []>} : vector<40x8xf32>, vector<8x64xf32>, vector<40x64xf32> -> vector<40x64xf32>
    %c0_96 = arith.constant 0 : index
    %c0_97 = arith.constant 0 : index
    %130 = vector.load %arg13[%c0_96, %c0_97] : memref<1x128xf32, #tpu.memory_space<vmem>>, vector<1x128xf32>
    %131 = vector.extract_strided_slice %128 {offsets = [0, 0], sizes = [8, 64], strides = [1, 1]} : vector<40x64xf32> to vector<8x64xf32>
    %c0_98 = arith.constant 0 : index
    %c0_99 = arith.constant 0 : index
    %c0_100 = arith.constant 0 : index
    %132 = vector.load %arg9[%c0_98, %c0_99, %c0_100] : memref<5x64x128xf32, #tpu.memory_space<vmem>>, vector<1x64x128xf32>
    %133 = vector.shape_cast %132 : vector<1x64x128xf32> to vector<64x128xf32>
    %cst_101 = arith.constant dense<0.000000e+00> : vector<8x128xf32>
    %134 = tpu.matmul %131, %133, %cst_101 {dimension_numbers = #tpu.dot_dimension_numbers<[1], [0], [0], [1], [0, 0, 1, 1], [], []>} : vector<8x64xf32>, vector<64x128xf32>, vector<8x128xf32> -> vector<8x128xf32>
    %135 = vector.broadcast %130 : vector<1x128xf32> to vector<8x128xf32>
    %136 = arith.addf %135, %134 : vector<8x128xf32>
    %137 = vector.extract_strided_slice %129 {offsets = [0, 0], sizes = [8, 64], strides = [1, 1]} : vector<40x64xf32> to vector<8x64xf32>
    %c0_102 = arith.constant 0 : index
    %c0_103 = arith.constant 0 : index
    %c0_104 = arith.constant 0 : index
    %138 = vector.load %arg10[%c0_102, %c0_103, %c0_104] : memref<5x64x128xf32, #tpu.memory_space<vmem>>, vector<1x64x128xf32>
    %139 = vector.shape_cast %138 : vector<1x64x128xf32> to vector<64x128xf32>
    %cst_105 = arith.constant dense<0.000000e+00> : vector<8x128xf32>
    %140 = tpu.matmul %137, %139, %cst_105 {dimension_numbers = #tpu.dot_dimension_numbers<[1], [0], [0], [1], [0, 0, 1, 1], [], []>} : vector<8x64xf32>, vector<64x128xf32>, vector<8x128xf32> -> vector<8x128xf32>
    %141 = arith.addf %136, %140 : vector<8x128xf32>
    %142 = vector.extract_strided_slice %128 {offsets = [8, 0], sizes = [8, 64], strides = [1, 1]} : vector<40x64xf32> to vector<8x64xf32>
    %c1_106 = arith.constant 1 : index
    %c0_107 = arith.constant 0 : index
    %c0_108 = arith.constant 0 : index
    %143 = vector.load %arg9[%c1_106, %c0_107, %c0_108] : memref<5x64x128xf32, #tpu.memory_space<vmem>>, vector<1x64x128xf32>
    %144 = vector.shape_cast %143 : vector<1x64x128xf32> to vector<64x128xf32>
    %cst_109 = arith.constant dense<0.000000e+00> : vector<8x128xf32>
    %145 = tpu.matmul %142, %144, %cst_109 {dimension_numbers = #tpu.dot_dimension_numbers<[1], [0], [0], [1], [0, 0, 1, 1], [], []>} : vector<8x64xf32>, vector<64x128xf32>, vector<8x128xf32> -> vector<8x128xf32>
    %146 = arith.addf %141, %145 : vector<8x128xf32>
    %147 = vector.extract_strided_slice %129 {offsets = [8, 0], sizes = [8, 64], strides = [1, 1]} : vector<40x64xf32> to vector<8x64xf32>
    %c1_110 = arith.constant 1 : index
    %c0_111 = arith.constant 0 : index
    %c0_112 = arith.constant 0 : index
    %148 = vector.load %arg10[%c1_110, %c0_111, %c0_112] : memref<5x64x128xf32, #tpu.memory_space<vmem>>, vector<1x64x128xf32>
    %149 = vector.shape_cast %148 : vector<1x64x128xf32> to vector<64x128xf32>
    %cst_113 = arith.constant dense<0.000000e+00> : vector<8x128xf32>
    %150 = tpu.matmul %147, %149, %cst_113 {dimension_numbers = #tpu.dot_dimension_numbers<[1], [0], [0], [1], [0, 0, 1, 1], [], []>} : vector<8x64xf32>, vector<64x128xf32>, vector<8x128xf32> -> vector<8x128xf32>
    %151 = arith.addf %146, %150 : vector<8x128xf32>
    %152 = vector.extract_strided_slice %128 {offsets = [16, 0], sizes = [8, 64], strides = [1, 1]} : vector<40x64xf32> to vector<8x64xf32>
    %c2_114 = arith.constant 2 : index
    %c0_115 = arith.constant 0 : index
    %c0_116 = arith.constant 0 : index
    %153 = vector.load %arg9[%c2_114, %c0_115, %c0_116] : memref<5x64x128xf32, #tpu.memory_space<vmem>>, vector<1x64x128xf32>
    %154 = vector.shape_cast %153 : vector<1x64x128xf32> to vector<64x128xf32>
    %cst_117 = arith.constant dense<0.000000e+00> : vector<8x128xf32>
    %155 = tpu.matmul %152, %154, %cst_117 {dimension_numbers = #tpu.dot_dimension_numbers<[1], [0], [0], [1], [0, 0, 1, 1], [], []>} : vector<8x64xf32>, vector<64x128xf32>, vector<8x128xf32> -> vector<8x128xf32>
    %156 = arith.addf %151, %155 : vector<8x128xf32>
    %157 = vector.extract_strided_slice %129 {offsets = [16, 0], sizes = [8, 64], strides = [1, 1]} : vector<40x64xf32> to vector<8x64xf32>
    %c2_118 = arith.constant 2 : index
    %c0_119 = arith.constant 0 : index
    %c0_120 = arith.constant 0 : index
    %158 = vector.load %arg10[%c2_118, %c0_119, %c0_120] : memref<5x64x128xf32, #tpu.memory_space<vmem>>, vector<1x64x128xf32>
    %159 = vector.shape_cast %158 : vector<1x64x128xf32> to vector<64x128xf32>
    %cst_121 = arith.constant dense<0.000000e+00> : vector<8x128xf32>
    %160 = tpu.matmul %157, %159, %cst_121 {dimension_numbers = #tpu.dot_dimension_numbers<[1], [0], [0], [1], [0, 0, 1, 1], [], []>} : vector<8x64xf32>, vector<64x128xf32>, vector<8x128xf32> -> vector<8x128xf32>
    %161 = arith.addf %156, %160 : vector<8x128xf32>
    %162 = vector.extract_strided_slice %128 {offsets = [24, 0], sizes = [8, 64], strides = [1, 1]} : vector<40x64xf32> to vector<8x64xf32>
    %c3_122 = arith.constant 3 : index
    %c0_123 = arith.constant 0 : index
    %c0_124 = arith.constant 0 : index
    %163 = vector.load %arg9[%c3_122, %c0_123, %c0_124] : memref<5x64x128xf32, #tpu.memory_space<vmem>>, vector<1x64x128xf32>
    %164 = vector.shape_cast %163 : vector<1x64x128xf32> to vector<64x128xf32>
    %cst_125 = arith.constant dense<0.000000e+00> : vector<8x128xf32>
    %165 = tpu.matmul %162, %164, %cst_125 {dimension_numbers = #tpu.dot_dimension_numbers<[1], [0], [0], [1], [0, 0, 1, 1], [], []>} : vector<8x64xf32>, vector<64x128xf32>, vector<8x128xf32> -> vector<8x128xf32>
    %166 = arith.addf %161, %165 : vector<8x128xf32>
    %167 = vector.extract_strided_slice %129 {offsets = [24, 0], sizes = [8, 64], strides = [1, 1]} : vector<40x64xf32> to vector<8x64xf32>
    %c3_126 = arith.constant 3 : index
    %c0_127 = arith.constant 0 : index
    %c0_128 = arith.constant 0 : index
    %168 = vector.load %arg10[%c3_126, %c0_127, %c0_128] : memref<5x64x128xf32, #tpu.memory_space<vmem>>, vector<1x64x128xf32>
    %169 = vector.shape_cast %168 : vector<1x64x128xf32> to vector<64x128xf32>
    %cst_129 = arith.constant dense<0.000000e+00> : vector<8x128xf32>
    %170 = tpu.matmul %167, %169, %cst_129 {dimension_numbers = #tpu.dot_dimension_numbers<[1], [0], [0], [1], [0, 0, 1, 1], [], []>} : vector<8x64xf32>, vector<64x128xf32>, vector<8x128xf32> -> vector<8x128xf32>
    %171 = arith.addf %166, %170 : vector<8x128xf32>
    %172 = vector.extract_strided_slice %128 {offsets = [32, 0], sizes = [8, 64], strides = [1, 1]} : vector<40x64xf32> to vector<8x64xf32>
    %c4_130 = arith.constant 4 : index
    %c0_131 = arith.constant 0 : index
    %c0_132 = arith.constant 0 : index
    %173 = vector.load %arg9[%c4_130, %c0_131, %c0_132] : memref<5x64x128xf32, #tpu.memory_space<vmem>>, vector<1x64x128xf32>
    %174 = vector.shape_cast %173 : vector<1x64x128xf32> to vector<64x128xf32>
    %cst_133 = arith.constant dense<0.000000e+00> : vector<8x128xf32>
    %175 = tpu.matmul %172, %174, %cst_133 {dimension_numbers = #tpu.dot_dimension_numbers<[1], [0], [0], [1], [0, 0, 1, 1], [], []>} : vector<8x64xf32>, vector<64x128xf32>, vector<8x128xf32> -> vector<8x128xf32>
    %176 = arith.addf %171, %175 : vector<8x128xf32>
    %177 = vector.extract_strided_slice %129 {offsets = [32, 0], sizes = [8, 64], strides = [1, 1]} : vector<40x64xf32> to vector<8x64xf32>
    %c4_134 = arith.constant 4 : index
    %c0_135 = arith.constant 0 : index
    %c0_136 = arith.constant 0 : index
    %178 = vector.load %arg10[%c4_134, %c0_135, %c0_136] : memref<5x64x128xf32, #tpu.memory_space<vmem>>, vector<1x64x128xf32>
    %179 = vector.shape_cast %178 : vector<1x64x128xf32> to vector<64x128xf32>
    %cst_137 = arith.constant dense<0.000000e+00> : vector<8x128xf32>
    %180 = tpu.matmul %177, %179, %cst_137 {dimension_numbers = #tpu.dot_dimension_numbers<[1], [0], [0], [1], [0, 0, 1, 1], [], []>} : vector<8x64xf32>, vector<64x128xf32>, vector<8x128xf32> -> vector<8x128xf32>
    %181 = arith.addf %176, %180 : vector<8x128xf32>
    %cst_138 = arith.constant 0.000000e+00 : f32
    %182 = vector.broadcast %cst_138 : f32 to vector<8x128xf32>
    %183 = arith.subf %182, %181 : vector<8x128xf32>
    %184 = math.exp %183 : vector<8x128xf32>
    %cst_139 = arith.constant 1.000000e+00 : f32
    %185 = vector.broadcast %cst_139 : f32 to vector<8x128xf32>
    %186 = arith.addf %185, %184 : vector<8x128xf32>
    %187 = tpu.reciprocal %186 {approx = true} : vector<8x128xf32> -> vector<8x128xf32>
    %188 = vector.extract_strided_slice %187 {offsets = [0, 0], sizes = [8, 64], strides = [1, 1]} : vector<8x128xf32> to vector<8x64xf32>
    %189 = vector.extract_strided_slice %187 {offsets = [0, 64], sizes = [8, 64], strides = [1, 1]} : vector<8x128xf32> to vector<8x64xf32>
    %190 = arith.mulf %188, %127 : vector<8x64xf32>
    %cst_140 = arith.constant dense<0.000000e+00> : vector<40x64xf32>
    %191 = tpu.matmul %0, %190, %cst_140 {dimension_numbers = #tpu.dot_dimension_numbers<[1], [0], [0], [1], [0, 0, 1, 1], [], []>} : vector<40x8xf32>, vector<8x64xf32>, vector<40x64xf32> -> vector<40x64xf32>
    %c0_141 = arith.constant 0 : index
    %c0_142 = arith.constant 0 : index
    %192 = vector.load %arg14[%c0_141, %c0_142] : memref<1x64xf32, #tpu.memory_space<vmem>>, vector<1x64xf32>
    %193 = vector.extract_strided_slice %128 {offsets = [0, 0], sizes = [8, 64], strides = [1, 1]} : vector<40x64xf32> to vector<8x64xf32>
    %c0_143 = arith.constant 0 : index
    %c0_144 = arith.constant 0 : index
    %c0_145 = arith.constant 0 : index
    %194 = vector.load %arg11[%c0_143, %c0_144, %c0_145] : memref<5x64x64xf32, #tpu.memory_space<vmem>>, vector<1x64x64xf32>
    %195 = vector.shape_cast %194 : vector<1x64x64xf32> to vector<64x64xf32>
    %cst_146 = arith.constant dense<0.000000e+00> : vector<8x64xf32>
    %196 = tpu.matmul %193, %195, %cst_146 {dimension_numbers = #tpu.dot_dimension_numbers<[1], [0], [0], [1], [0, 0, 1, 1], [], []>} : vector<8x64xf32>, vector<64x64xf32>, vector<8x64xf32> -> vector<8x64xf32>
    %197 = vector.broadcast %192 : vector<1x64xf32> to vector<8x64xf32>
    %198 = arith.addf %197, %196 : vector<8x64xf32>
    %199 = vector.extract_strided_slice %191 {offsets = [0, 0], sizes = [8, 64], strides = [1, 1]} : vector<40x64xf32> to vector<8x64xf32>
    %c0_147 = arith.constant 0 : index
    %c0_148 = arith.constant 0 : index
    %c0_149 = arith.constant 0 : index
    %200 = vector.load %arg12[%c0_147, %c0_148, %c0_149] : memref<5x64x64xf32, #tpu.memory_space<vmem>>, vector<1x64x64xf32>
    %201 = vector.shape_cast %200 : vector<1x64x64xf32> to vector<64x64xf32>
    %cst_150 = arith.constant dense<0.000000e+00> : vector<8x64xf32>
    %202 = tpu.matmul %199, %201, %cst_150 {dimension_numbers = #tpu.dot_dimension_numbers<[1], [0], [0], [1], [0, 0, 1, 1], [], []>} : vector<8x64xf32>, vector<64x64xf32>, vector<8x64xf32> -> vector<8x64xf32>
    %203 = arith.addf %198, %202 : vector<8x64xf32>
    %204 = vector.extract_strided_slice %128 {offsets = [8, 0], sizes = [8, 64], strides = [1, 1]} : vector<40x64xf32> to vector<8x64xf32>
    %c1_151 = arith.constant 1 : index
    %c0_152 = arith.constant 0 : index
    %c0_153 = arith.constant 0 : index
    %205 = vector.load %arg11[%c1_151, %c0_152, %c0_153] : memref<5x64x64xf32, #tpu.memory_space<vmem>>, vector<1x64x64xf32>
    %206 = vector.shape_cast %205 : vector<1x64x64xf32> to vector<64x64xf32>
    %cst_154 = arith.constant dense<0.000000e+00> : vector<8x64xf32>
    %207 = tpu.matmul %204, %206, %cst_154 {dimension_numbers = #tpu.dot_dimension_numbers<[1], [0], [0], [1], [0, 0, 1, 1], [], []>} : vector<8x64xf32>, vector<64x64xf32>, vector<8x64xf32> -> vector<8x64xf32>
    %208 = arith.addf %203, %207 : vector<8x64xf32>
    %209 = vector.extract_strided_slice %191 {offsets = [8, 0], sizes = [8, 64], strides = [1, 1]} : vector<40x64xf32> to vector<8x64xf32>
    %c1_155 = arith.constant 1 : index
    %c0_156 = arith.constant 0 : index
    %c0_157 = arith.constant 0 : index
    %210 = vector.load %arg12[%c1_155, %c0_156, %c0_157] : memref<5x64x64xf32, #tpu.memory_space<vmem>>, vector<1x64x64xf32>
    %211 = vector.shape_cast %210 : vector<1x64x64xf32> to vector<64x64xf32>
    %cst_158 = arith.constant dense<0.000000e+00> : vector<8x64xf32>
    %212 = tpu.matmul %209, %211, %cst_158 {dimension_numbers = #tpu.dot_dimension_numbers<[1], [0], [0], [1], [0, 0, 1, 1], [], []>} : vector<8x64xf32>, vector<64x64xf32>, vector<8x64xf32> -> vector<8x64xf32>
    %213 = arith.addf %208, %212 : vector<8x64xf32>
    %214 = vector.extract_strided_slice %128 {offsets = [16, 0], sizes = [8, 64], strides = [1, 1]} : vector<40x64xf32> to vector<8x64xf32>
    %c2_159 = arith.constant 2 : index
    %c0_160 = arith.constant 0 : index
    %c0_161 = arith.constant 0 : index
    %215 = vector.load %arg11[%c2_159, %c0_160, %c0_161] : memref<5x64x64xf32, #tpu.memory_space<vmem>>, vector<1x64x64xf32>
    %216 = vector.shape_cast %215 : vector<1x64x64xf32> to vector<64x64xf32>
    %cst_162 = arith.constant dense<0.000000e+00> : vector<8x64xf32>
    %217 = tpu.matmul %214, %216, %cst_162 {dimension_numbers = #tpu.dot_dimension_numbers<[1], [0], [0], [1], [0, 0, 1, 1], [], []>} : vector<8x64xf32>, vector<64x64xf32>, vector<8x64xf32> -> vector<8x64xf32>
    %218 = arith.addf %213, %217 : vector<8x64xf32>
    %219 = vector.extract_strided_slice %191 {offsets = [16, 0], sizes = [8, 64], strides = [1, 1]} : vector<40x64xf32> to vector<8x64xf32>
    %c2_163 = arith.constant 2 : index
    %c0_164 = arith.constant 0 : index
    %c0_165 = arith.constant 0 : index
    %220 = vector.load %arg12[%c2_163, %c0_164, %c0_165] : memref<5x64x64xf32, #tpu.memory_space<vmem>>, vector<1x64x64xf32>
    %221 = vector.shape_cast %220 : vector<1x64x64xf32> to vector<64x64xf32>
    %cst_166 = arith.constant dense<0.000000e+00> : vector<8x64xf32>
    %222 = tpu.matmul %219, %221, %cst_166 {dimension_numbers = #tpu.dot_dimension_numbers<[1], [0], [0], [1], [0, 0, 1, 1], [], []>} : vector<8x64xf32>, vector<64x64xf32>, vector<8x64xf32> -> vector<8x64xf32>
    %223 = arith.addf %218, %222 : vector<8x64xf32>
    %224 = vector.extract_strided_slice %128 {offsets = [24, 0], sizes = [8, 64], strides = [1, 1]} : vector<40x64xf32> to vector<8x64xf32>
    %c3_167 = arith.constant 3 : index
    %c0_168 = arith.constant 0 : index
    %c0_169 = arith.constant 0 : index
    %225 = vector.load %arg11[%c3_167, %c0_168, %c0_169] : memref<5x64x64xf32, #tpu.memory_space<vmem>>, vector<1x64x64xf32>
    %226 = vector.shape_cast %225 : vector<1x64x64xf32> to vector<64x64xf32>
    %cst_170 = arith.constant dense<0.000000e+00> : vector<8x64xf32>
    %227 = tpu.matmul %224, %226, %cst_170 {dimension_numbers = #tpu.dot_dimension_numbers<[1], [0], [0], [1], [0, 0, 1, 1], [], []>} : vector<8x64xf32>, vector<64x64xf32>, vector<8x64xf32> -> vector<8x64xf32>
    %228 = arith.addf %223, %227 : vector<8x64xf32>
    %229 = vector.extract_strided_slice %191 {offsets = [24, 0], sizes = [8, 64], strides = [1, 1]} : vector<40x64xf32> to vector<8x64xf32>
    %c3_171 = arith.constant 3 : index
    %c0_172 = arith.constant 0 : index
    %c0_173 = arith.constant 0 : index
    %230 = vector.load %arg12[%c3_171, %c0_172, %c0_173] : memref<5x64x64xf32, #tpu.memory_space<vmem>>, vector<1x64x64xf32>
    %231 = vector.shape_cast %230 : vector<1x64x64xf32> to vector<64x64xf32>
    %cst_174 = arith.constant dense<0.000000e+00> : vector<8x64xf32>
    %232 = tpu.matmul %229, %231, %cst_174 {dimension_numbers = #tpu.dot_dimension_numbers<[1], [0], [0], [1], [0, 0, 1, 1], [], []>} : vector<8x64xf32>, vector<64x64xf32>, vector<8x64xf32> -> vector<8x64xf32>
    %233 = arith.addf %228, %232 : vector<8x64xf32>
    %234 = vector.extract_strided_slice %128 {offsets = [32, 0], sizes = [8, 64], strides = [1, 1]} : vector<40x64xf32> to vector<8x64xf32>
    %c4_175 = arith.constant 4 : index
    %c0_176 = arith.constant 0 : index
    %c0_177 = arith.constant 0 : index
    %235 = vector.load %arg11[%c4_175, %c0_176, %c0_177] : memref<5x64x64xf32, #tpu.memory_space<vmem>>, vector<1x64x64xf32>
    %236 = vector.shape_cast %235 : vector<1x64x64xf32> to vector<64x64xf32>
    %cst_178 = arith.constant dense<0.000000e+00> : vector<8x64xf32>
    %237 = tpu.matmul %234, %236, %cst_178 {dimension_numbers = #tpu.dot_dimension_numbers<[1], [0], [0], [1], [0, 0, 1, 1], [], []>} : vector<8x64xf32>, vector<64x64xf32>, vector<8x64xf32> -> vector<8x64xf32>
    %238 = arith.addf %233, %237 : vector<8x64xf32>
    %239 = vector.extract_strided_slice %191 {offsets = [32, 0], sizes = [8, 64], strides = [1, 1]} : vector<40x64xf32> to vector<8x64xf32>
    %c4_179 = arith.constant 4 : index
    %c0_180 = arith.constant 0 : index
    %c0_181 = arith.constant 0 : index
    %240 = vector.load %arg12[%c4_179, %c0_180, %c0_181] : memref<5x64x64xf32, #tpu.memory_space<vmem>>, vector<1x64x64xf32>
    %241 = vector.shape_cast %240 : vector<1x64x64xf32> to vector<64x64xf32>
    %cst_182 = arith.constant dense<0.000000e+00> : vector<8x64xf32>
    %242 = tpu.matmul %239, %241, %cst_182 {dimension_numbers = #tpu.dot_dimension_numbers<[1], [0], [0], [1], [0, 0, 1, 1], [], []>} : vector<8x64xf32>, vector<64x64xf32>, vector<8x64xf32> -> vector<8x64xf32>
    %243 = arith.addf %238, %242 : vector<8x64xf32>
    %244 = math.tanh %243 : vector<8x64xf32>
    %245 = arith.mulf %189, %127 : vector<8x64xf32>
    %cst_183 = arith.constant 1.000000e+00 : f32
    %246 = vector.broadcast %cst_183 : f32 to vector<8x64xf32>
    %247 = arith.subf %246, %189 : vector<8x64xf32>
    %248 = arith.mulf %247, %244 : vector<8x64xf32>
    %249 = arith.addf %245, %248 : vector<8x64xf32>
    %250 = tpu.concatenate %125, %249 in 1 : vector<8x64xf32>, vector<8x64xf32> -> vector<8x128xf32>
    %c0_184 = arith.constant 0 : index
    %c0_185 = arith.constant 0 : index
    %251 = vector.load %arg15[%c0_184, %c0_185] : memref<8x128xf32, #tpu.memory_space<vmem>>, vector<8x128xf32>
    tpu.vector_store %arg15[%c0_184, %c0_185], %250 {strides = array<i32>} : memref<8x128xf32, #tpu.memory_space<vmem>>, vector<8x128xf32>,
    return
  }
}

</mosaic_0001>

<bundles_post_ra>
// kernel: tpu_custom_call.1
= control target key start
LH: loop header
LB: loop body
LE: loop exit
PB: predicated region body
PF: predicated region fallthrough
CT: control target
= control target key end

     0   :  { %s6606_s0 = inlined_call_operand.hbm [shape: f32[8,8], index: 0, kind: input, shape index: {}]   ;;  %s6607_s1 = inlined_call_operand.vmem [shape: f32[2,8,64], index: 1, kind: input, shape index: {}]   ;;  %s6608_s2 = inlined_call_operand.vmem [shape: f32[40,8], index: 2, kind: input, shape index: {}]   ;;  %s6609_s3 = inlined_call_operand.vmem [shape: f32[5,8,128], index: 3, kind: input, shape index: {}]   ;;  %s6610_s4 = inlined_call_operand.hbm [shape: f32[5,64,128], index: 4, kind: input, shape index: {}]   ;;  %s6611_s5 = inlined_call_operand.hbm [shape: f32[5,8,64], index: 5, kind: input, shape index: {}]   ;;  %s6612_s6 = inlined_call_operand.hbm [shape: f32[5,64,64], index: 6, kind: input, shape index: {}]   ;;  %s6613_s7 = inlined_call_operand.vmem [shape: f32[1,128], index: 7, kind: input, shape index: {}]   ;;  %s6614_s8 = inlined_call_operand.vmem [shape: f32[1,64], index: 8, kind: input, shape index: {}]   ;;  %s6615_s9 = inlined_call_operand.hbm [shape: f32[5,64,128], index: 9, kind: input, shape index: {}]   ;;  %s6616_s10 = inlined_call_operand.hbm [shape: f32[5,64,128], index: 10, kind: input, shape index: {}]   ;;  %s6617_s11 = inlined_call_operand.hbm [shape: f32[5,64,64], index: 11, kind: input, shape index: {}]   ;;  %s6618_s12 = inlined_call_operand.hbm [shape: f32[5,64,64], index: 12, kind: input, shape index: {}]   ;;  %s6619_s13 = inlined_call_operand.vmem [shape: f32[1,128], index: 13, kind: input, shape index: {}]   ;;  %s6620_s14 = inlined_call_operand.vmem [shape: f32[1,64], index: 14, kind: input, shape index: {}]   ;;  %s6621_s15 = inlined_call_operand.hbm [shape: f32[8,128], index: 15, kind: output, shape index: {}]  }
   0x1   :  { %6623 = sst [smem:[#allocation23_spill]] %s6621_s15 }
   0x2   :  { %20 = vsyncpa [#allocation3], 0 }
   0x3   :  { %21 = vsyncpa [#allocation6], 0 }
   0x4   :  { %22 = vsyncpa [#allocation9], 0 }
   0x5   :  { %23 = vsyncpa [#allocation12], 0 }
   0x6   :  { %24 = vsyncpa [#allocation15], 0 }
   0x7   :  { %25 = vsyncpa [#allocation4], 0  ;;  %s5832_s18 = smov [#allocation5]   ;;  %s5622_s22 = scalar_lea.hbm %s6610_s4, 5120 }
   0x8   :  { %s47_s19 = sshll.u32 %s5832_s18, 4  ;;  %p5623_p0 = scmp.ne.s32.totalorder %s6610_s4, %s5622_s22  ;;  %s48_s19 = int_to_ptr.vmem [resolvable:$true] %s47_s19 }
   0x9   :  { %p5626_p1 = scmp.lt.u32.totalorder %s5622_s22, %s6610_s4 }
   0xb   :  { %p5628_p2 = pnand %p5626_p1, %p5623_p0 }
   0xd   :  { %5631 = shalt.err (!%p5628_p2)
}
   0xe   :  { %s5632_s27 = scalar_lea.vmem %s48_s19, 5120  ;;  %p5637_p4 = scmp.lt.s32.totalorder %s48_s19, %s48_s19 }
   0xf   :  { %p5633_p3 = scmp.ne.s32.totalorder %s48_s19, %s5632_s27  ;;  %p5638_p5 = scmp.lt.s32.totalorder %s5632_s27, %s5632_s27 }
  0x11   :  { %p5639_p6 = por %p5638_p5, %p5637_p4 }
  0x13   :  { %p5640_p7 = pnand %p5639_p6, %p5633_p3 }
  0x15   :  { %5643 = shalt.err (!%p5640_p7)
}
  0x16   :  { %s5833_s28 = smov 128   ;;  %s5834_s29 = smov 8  }
  0x17   :  { %53 = dma.hbm_to_vmem [thread:$0]  %s6610_s4, 5120, %s48_s19, [#allocation6], %s5833_s28, %s5833_s28, %s5834_s29  }
  0x18   :  { %s5835_s17 = smov [#allocation8]   ;;  %s5836_s20 = smov [#allocation11]  }
  0x19   :  { %s71_s18 = sshll.u32 %s5835_s17, 4  ;;  %s99_s21 = sshll.u32 %s5836_s20, 4  ;;  %s72_s18 = int_to_ptr.vmem [resolvable:$true] %s71_s18  ;;  %s100_s21 = int_to_ptr.vmem [resolvable:$true] %s99_s21 }
  0x1a   :  { %s5644_s24 = scalar_lea.hbm %s6612_s6, 5120 }
  0x1b   :  { %p5645_p8 = scmp.ne.s32.totalorder %s6612_s6, %s5644_s24  ;;  %p5648_p9 = scmp.lt.u32.totalorder %s5644_s24, %s6612_s6 }
  0x1d   :  { %p5650_p10 = pnand %p5648_p9, %p5645_p8 }
  0x1f   :  { %5653 = shalt.err (!%p5650_p10)
}
  0x20   :  { %s5654_s4 = scalar_lea.vmem %s72_s18, 5120  ;;  %p5659_p12 = scmp.lt.s32.totalorder %s72_s18, %s72_s18 }
  0x21   :  { %p5655_p11 = scmp.ne.s32.totalorder %s72_s18, %s5654_s4  ;;  %p5660_p13 = scmp.lt.s32.totalorder %s5654_s4, %s5654_s4 }
  0x23   :  { %p5661_p0 = por %p5660_p13, %p5659_p12 }
  0x25   :  { %p5662_p1 = pnand %p5661_p0, %p5655_p11 }
  0x27   :  { %5665 = shalt.err (!%p5662_p1)
}
  0x28   :  { %77 = dma.hbm_to_vmem [thread:$0]  %s6612_s6, 5120, %s72_s18, [#allocation9], %s5833_s28, %s5833_s28, %s5834_s29  }
  0x29   :  { %s5666_s17 = scalar_lea.hbm %s6616_s10, 5120 }
  0x2a   :  { %p5667_p2 = scmp.ne.s32.totalorder %s6616_s10, %s5666_s17  ;;  %p5670_p3 = scmp.lt.u32.totalorder %s5666_s17, %s6616_s10 }
  0x2c   :  { %p5672_p4 = pnand %p5670_p3, %p5667_p2 }
  0x2e   :  { %5675 = shalt.err (!%p5672_p4)
}
  0x2f   :  { %s5676_s25 = scalar_lea.vmem %s100_s21, 5120  ;;  %p5681_p6 = scmp.lt.s32.totalorder %s100_s21, %s100_s21 }
  0x30   :  { %p5677_p5 = scmp.ne.s32.totalorder %s100_s21, %s5676_s25  ;;  %p5682_p7 = scmp.lt.s32.totalorder %s5676_s25, %s5676_s25 }
  0x32   :  { %p5683_p8 = por %p5682_p7, %p5681_p6 }
  0x34   :  { %p5684_p9 = pnand %p5683_p8, %p5677_p5 }
  0x36   :  { %5687 = shalt.err (!%p5684_p9)
}
  0x37   :  { %105 = dma.hbm_to_vmem [thread:$0]  %s6616_s10, 5120, %s100_s21, [#allocation12], %s5833_s28, %s5833_s28, %s5834_s29  }
  0x38   :  { %s5837_s26 = smov [#allocation2]   ;;  %s5838_s4 = smov [#allocation7]  }
  0x39   :  { %s32_s27 = sshll.u32 %s5837_s26, 4  ;;  %s59_s19 = sshll.u32 %s5838_s4, 4  ;;  %s33_s27 = int_to_ptr.vmem [resolvable:$true] %s32_s27  ;;  %s60_s19 = int_to_ptr.vmem [resolvable:$true] %s59_s19 }
  0x3a   :  { %s5688_s15 = scalar_lea.hbm %s6606_s0, 128 }
  0x3b   :  { %p5689_p10 = scmp.ne.s32.totalorder %s6606_s0, %s5688_s15  ;;  %p5692_p11 = scmp.lt.u32.totalorder %s5688_s15, %s6606_s0 }
  0x3d   :  { %p5694_p12 = pnand %p5692_p11, %p5689_p10 }
  0x3f   :  { %5697 = shalt.err (!%p5694_p12)
}
  0x40   :  { %s5698_s10 = scalar_lea.vmem %s33_s27, 128  ;;  %p5703_p0 = scmp.lt.s32.totalorder %s33_s27, %s33_s27 }
  0x41   :  { %p5699_p13 = scmp.ne.s32.totalorder %s33_s27, %s5698_s10  ;;  %p5704_p1 = scmp.lt.s32.totalorder %s5698_s10, %s5698_s10 }
  0x43   :  { %p5705_p2 = por %p5704_p1, %p5703_p0 }
  0x45   :  { %p5706_p3 = pnand %p5705_p2, %p5699_p13 }
  0x47   :  { %5709 = shalt.err (!%p5706_p3)
}
  0x48   :  { %35 = dma.hbm_to_vmem [thread:$0]  %s6606_s0, 128, %s33_s27, [#allocation3]  }
  0x49   :  { %s5710_s18 = scalar_lea.hbm %s6611_s5, 640 }
  0x4a   :  { %p5711_p4 = scmp.ne.s32.totalorder %s6611_s5, %s5710_s18  ;;  %p5714_p5 = scmp.lt.u32.totalorder %s5710_s18, %s6611_s5 }
  0x4c   :  { %p5716_p6 = pnand %p5714_p5, %p5711_p4 }
  0x4e   :  { %5719 = shalt.err (!%p5716_p6)
}
  0x4f   :  { %s5720_s15 = scalar_lea.vmem %s60_s19, 640  ;;  %p5725_p8 = scmp.lt.s32.totalorder %s60_s19, %s60_s19 }
  0x50   :  { %p5721_p7 = scmp.ne.s32.totalorder %s60_s19, %s5720_s15  ;;  %p5726_p9 = scmp.lt.s32.totalorder %s5720_s15, %s5720_s15 }
  0x52   :  { %p5727_p10 = por %p5726_p9, %p5725_p8 }
  0x54   :  { %p5728_p11 = pnand %p5727_p10, %p5721_p7 }
  0x56   :  { %5731 = shalt.err (!%p5728_p11)
}
  0x57   :  { %65 = dma.hbm_to_vmem [thread:$0]  %s6611_s5, 640, %s60_s19, [#allocation6], %s5833_s28, %s5833_s28, %s5834_s29  }
  0x58   :  { %s5839_s17 = smov [#allocation10]   ;;  %s5840_s22 = smov [#allocation13]  }
  0x59   :  { %s87_s20 = sshll.u32 %s5839_s17, 4  ;;  %s111_s23 = sshll.u32 %s5840_s22, 4  ;;  %s88_s20 = int_to_ptr.vmem [resolvable:$true] %s87_s20  ;;  %s112_s23 = int_to_ptr.vmem [resolvable:$true] %s111_s23 }
  0x5a   :  { %s5732_s24 = scalar_lea.hbm %s6615_s9, 5120 }
  0x5b   :  { %p5733_p12 = scmp.ne.s32.totalorder %s6615_s9, %s5732_s24  ;;  %p5736_p13 = scmp.lt.u32.totalorder %s5732_s24, %s6615_s9 }
  0x5d   :  { %p5738_p0 = pnand %p5736_p13, %p5733_p12 }
  0x5f   :  { %5741 = shalt.err (!%p5738_p0)
}
  0x60   :  { %s5742_s5 = scalar_lea.vmem %s88_s20, 5120  ;;  %p5747_p2 = scmp.lt.s32.totalorder %s88_s20, %s88_s20 }
  0x61   :  { %p5743_p1 = scmp.ne.s32.totalorder %s88_s20, %s5742_s5  ;;  %p5748_p3 = scmp.lt.s32.totalorder %s5742_s5, %s5742_s5 }
  0x63   :  { %p5749_p4 = por %p5748_p3, %p5747_p2 }
  0x65   :  { %p5750_p5 = pnand %p5749_p4, %p5743_p1 }
  0x67   :  { %5753 = shalt.err (!%p5750_p5)
}
  0x68   :  { %93 = dma.hbm_to_vmem [thread:$0]  %s6615_s9, 5120, %s88_s20, [#allocation9], %s5833_s28, %s5833_s28, %s5834_s29  }
  0x69   :  { %s5754_s15 = scalar_lea.hbm %s6617_s11, 5120 }
  0x6a   :  { %p5755_p6 = scmp.ne.s32.totalorder %s6617_s11, %s5754_s15  ;;  %p5758_p7 = scmp.lt.u32.totalorder %s5754_s15, %s6617_s11 }
  0x6c   :  { %p5760_p8 = pnand %p5758_p7, %p5755_p6 }
  0x6e   :  { %5763 = shalt.err (!%p5760_p8)
}
  0x6f   :  { %s5764_s10 = scalar_lea.vmem %s112_s23, 5120  ;;  %p5769_p10 = scmp.lt.s32.totalorder %s112_s23, %s112_s23 }
  0x70   :  { %p5765_p9 = scmp.ne.s32.totalorder %s112_s23, %s5764_s10  ;;  %p5770_p11 = scmp.lt.s32.totalorder %s5764_s10, %s5764_s10 }
  0x72   :  { %p5771_p12 = por %p5770_p11, %p5769_p10 }
  0x74   :  { %p5772_p13 = pnand %p5771_p12, %p5765_p9 }
  0x76   :  { %5775 = shalt.err (!%p5772_p13)
}
  0x77   :  { %117 = dma.hbm_to_vmem [thread:$0]  %s6617_s11, 5120, %s112_s23, [#allocation12], %s5833_s28, %s5833_s28, %s5834_s29  }
  0x78   :  { %s5841_s21 = smov [#allocation14]   ;;  %s5776_s18 = scalar_lea.hbm %s6618_s12, 5120 }
  0x79   :  { %s123_s24 = sshll.u32 %s5841_s21, 4  ;;  %p5777_p0 = scmp.ne.s32.totalorder %s6618_s12, %s5776_s18  ;;  %s124_s24 = int_to_ptr.vmem [resolvable:$true] %s123_s24 }
  0x7a   :  { %p5780_p1 = scmp.lt.u32.totalorder %s5776_s18, %s6618_s12 }
  0x7c   :  { %p5782_p2 = pnand %p5780_p1, %p5777_p0 }
  0x7e   :  { %5785 = shalt.err (!%p5782_p2)
}
  0x7f   :  { %s5786_s30 = scalar_lea.vmem %s124_s24, 5120  ;;  %p5791_p4 = scmp.lt.s32.totalorder %s124_s24, %s124_s24 }
  0x80   :  { %p5787_p3 = scmp.ne.s32.totalorder %s124_s24, %s5786_s30  ;;  %p5792_p5 = scmp.lt.s32.totalorder %s5786_s30, %s5786_s30 }
  0x82   :  { %p5793_p6 = por %p5792_p5, %p5791_p4 }
  0x84   :  { %p5794_p7 = pnand %p5793_p6, %p5787_p3 }
  0x86   :  { %5797 = shalt.err (!%p5794_p7)
}
  0x87   :  { %129 = dma.hbm_to_vmem [thread:$0]  %s6618_s12, 5120, %s124_s24, [#allocation15], %s5833_s28, %s5833_s28, %s5834_s29  }
  0x88   :  { %5820 = dma.done.wait [#allocation3], 128  }
  0x89   :  { %5821 = vsyncadd [#allocation3], 4294967168 }
  0x8a   :  { %5822 = dma.done.wait [#allocation6], 5760  }
  0x8b   :  { %5823 = vsyncadd [#allocation6], 4294961536 }
  0x8c   :  { %5824 = dma.done.wait [#allocation9], 10240  }
  0x8d   :  { %5825 = vsyncadd [#allocation9], 4294957056 }
  0x8e   :  { %5826 = dma.done.wait [#allocation12], 10240  }
  0x8f   :  { %5827 = vsyncadd [#allocation12], 4294957056 }
  0x90   :  { %5828 = dma.done.wait [#allocation15], 5120  }
  0x91   :  { %5829 = vsyncadd [#allocation15], 4294962176  ;;  %v5842_v0 = vmov 0.0   ;;  %vm5843_vm0 = vmmov 0   ;;  %vm165_vm1 = vcmask 64512   ;;  %v163_v1 = vld [vmem:[#allocation2] sm:$0xff] }
  0x92   :  { %4432 = vmatprep.subr.mxu0 %v5842_v0  ;;  %4434 = vmatprep.mubr.msk.f32.mxu0 %vm5843_vm0, %v5842_v0  ;;  %v6053_v2 = vld [vmem:[%s6608_s2] sm:$0xff]  ;;  %v6073_v5 = vld [vmem:[%s6608_s2 + $0x8] sm:$0xff]  ;;  %v6088_v6 = vld [vmem:[%s6608_s2 + $0x10] sm:$0xff]  ;;  %v5844_v9 = vmov 0.0|0.0   ;;  %s5845_s25 = smov 64   ;;  %vm451_vm2 = vcmask 523264  }
  0x93   :  { %4449 = vmatprep.subr.mxu1 %v5842_v0  ;;  %4451 = vmatprep.mubr.msk.f32.mxu1 %vm5843_vm0, %v5842_v0  ;;  %v6058_v3 = vld [vmem:[%s6607_s1] sm:$0xff]  ;;  %v6101_v7 = vld [vmem:[%s6608_s2 + $0x18] sm:$0xff]  ;;  %v443_v10 = vld [vmem:[#allocation5] sm:$0xff]  ;;  %s5846_s24 = smov [#allocation16]  }
  0x94   :  { %4433 = vmatpush3.msra.mxu0 %v163_v1  ;;  %4450 = vmatpush3.msra.mxu1 %v6058_v3  ;;  %v362_v4 = vld [vmem:[%s6609_s3] sm:$0xff]  ;;  %v444_v11 = vld [vmem:[#allocation5 + $0x8] sm:$0xff]  ;;  %v445_v13 = vld [vmem:[#allocation5 + $0x10] sm:$0xff]  ;;  %s4014_s6 = sshll.u32 %s5846_s24, 4  ;;  %s4015_s6 = int_to_ptr.vmem [resolvable:$true] %s4014_s6 }
  0x95   :  { %4435 = vmatmul.mubr.msk.f32.vlgmr.msra.gmra.mrb[0].mxu0 %vm165_vm1, %v6053_v2  ;;  %4452 = vmatmul.mubr.msk.f32.vlgmr.msra.gmra.mrb[0].mxu1 %vm165_vm1, %v6053_v2  ;;  %v6114_v8 = vld [vmem:[%s6608_s2 + $0x20] sm:$0xff]  ;;  %v5155_v12 = vpack.c.bf16 %v444_v11, %v443_v10  ;;  %v447_v20 = vld [vmem:[#allocation5 + $0x20] sm:$0xff]  ;;  %v448_v21 = vld [vmem:[#allocation5 + $0x28] sm:$0xff]  ;;  %p5803_p9 = scmp.lt.s32.totalorder %s4015_s6, %s4015_s6 }
  0x96   :  { %4437 = vmatprep.mubr.msk.f32.mxu0 %vm5843_vm0, %v5842_v0  ;;  %4454 = vmatprep.mubr.msk.f32.mxu1 %vm5843_vm0, %v5842_v0  ;;  %v446_v14 = vld [vmem:[#allocation5 + $0x18] sm:$0xff]  ;;  %v5161_v26 = vpack.c.bf16 %v448_v21, %v447_v20  ;;  %v449_v27 = vld [vmem:[#allocation5 + $0x30] sm:$0xff]  ;;  %v4040_v38 = vld [vmem:[%s6609_s3 + $0x8] sm:$0xff] }
  0x97   :  { %4466 = vmatprep.subr.mxu0 %v5842_v0  ;;  %4586 = vmatprep.subr.mxu1 %v5842_v0  ;;  %v5158_v19 = vpack.c.bf16 %v446_v14, %v445_v13  ;;  %v450_v28 = vld [vmem:[#allocation5 + $0x38] sm:$0xff]  ;;  %v603_v43 = vld [vmem:[#allocation5 + $0x40] sm:$0xff]  ;;  %v604_v44 = vld [vmem:[#allocation5 + $0x48] sm:$0xff] }
  0x98   :  { %4467 = vmatpush3.msra.mxu0 %v362_v4  ;;  %2045 = vrot.lane.b32.xlu0 %v6058_v3, %s5845_s25  ;;  %v5164_v33 = vpack.c.bf16 %v450_v28, %v449_v27  ;;  %v5167_v45 = vpack.c.bf16 %v604_v44, %v603_v43  ;;  %v605_v46 = vld [vmem:[#allocation5 + $0x50] sm:$0xff]  ;;  %v606_v47 = vld [vmem:[#allocation5 + $0x58] sm:$0xff]  ;;  %v607_v49 = vld [vmem:[#allocation5 + $0x60] sm:$0xff] }
  0x99   :  { %4438 = vmatmul.mubr.msk.f32.gmra.mrb[2].mxu0 %vm165_vm1, %v6073_v5  ;;  %4455 = vmatmul.mubr.msk.f32.gmra.mrb[2].mxu1 %vm165_vm1, %v6073_v5  ;;  %v5170_v48 = vpack.c.bf16 %v606_v47, %v605_v46  ;;  %v608_v50 = vld [vmem:[#allocation5 + $0x68] sm:$0xff]  ;;  %v609_v52 = vld [vmem:[#allocation5 + $0x70] sm:$0xff]  ;;  %v610_v53 = vld [vmem:[#allocation5 + $0x78] sm:$0xff] }
  0x9a   :  { %4440 = vmatprep.mubr.msk.f32.mxu0 %vm5843_vm0, %v5842_v0  ;;  %4457 = vmatprep.mubr.msk.f32.mxu1 %vm5843_vm0, %v5842_v0  ;;  %v5173_v51 = vpack.c.bf16 %v608_v50, %v607_v49  ;;  %v5176_v54 = vpack.c.bf16 %v610_v53, %v609_v52  ;;  %v4043_v55 = vld [vmem:[%s6609_s3 + $0x10] sm:$0xff]  ;;  %v762_v56 = vld [vmem:[#allocation5 + $0x80] sm:$0xff]  ;;  %v764_v59 = vld [vmem:[#allocation5 + $0x90] sm:$0xff] }
  0x9b   :  { %5154 = vmatprep.subr.bf16.mxu0 %v5844_v9  ;;  %v763_v57 = vld [vmem:[#allocation5 + $0x88] sm:$0xff]  ;;  %v765_v60 = vld [vmem:[#allocation5 + $0x98] sm:$0xff]  ;;  %v766_v62 = vld [vmem:[#allocation5 + $0xa0] sm:$0xff] }
  0x9c   :  { %v5179_v58 = vpack.c.bf16 %v763_v57, %v762_v56  ;;  %v5182_v61 = vpack.c.bf16 %v765_v60, %v764_v59  ;;  %v767_v63 = vld [vmem:[#allocation5 + $0xa8] sm:$0xff]  ;;  %v768_v4 = vld [vmem:[#allocation5 + $0xb0] sm:$0xff]  ;;  %v769_v10 = vld [vmem:[#allocation5 + $0xb8] sm:$0xff] }
  0x9d   :  { %4441 = vmatmul.mubr.msk.f32.gmra.mrb[4].mxu0 %vm165_vm1, %v6088_v6  ;;  %4458 = vmatmul.mubr.msk.f32.gmra.mrb[4].mxu1 %vm165_vm1, %v6088_v6  ;;  %v5185_v1 = vpack.c.bf16 %v767_v63, %v766_v62  ;;  %v5188_v11 = vpack.c.bf16 %v769_v10, %v768_v4  ;;  %v921_v13 = vld [vmem:[#allocation5 + $0xc0] sm:$0xff]  ;;  %v922_v14 = vld [vmem:[#allocation5 + $0xc8] sm:$0xff]  ;;  %v4049_v27 = vld [vmem:[%s6609_s3 + $0x20] sm:$0xff] }
  0x9e   :  { %4443 = vmatprep.mubr.msk.f32.mxu0 %vm5843_vm0, %v5842_v0  ;;  %4460 = vmatprep.mubr.msk.f32.mxu1 %vm5843_vm0, %v5842_v0  ;;  %v925_v20 = vld [vmem:[#allocation5 + $0xe0] sm:$0xff]  ;;  %v926_v21 = vld [vmem:[#allocation5 + $0xe8] sm:$0xff]  ;;  %v4038_v44 = vld [vmem:[%s6613_s7] ss:$0 sm:$0xff] }
  0x9f   :  { %v1080_v28 = vld [vmem:[#allocation5 + $0x100] sm:$0xff]  ;;  %v1339_v56 = vld [vmem:[#allocation8 + $0x10] sm:$0xff]  ;;  %v1341_v59 = vld [vmem:[#allocation8 + $0x20] sm:$0xff] }
  0xa0   :  { %v1259_v53 = vld [vmem:[#allocation7] sm:$0xff]  ;;  %v1342_v60 = vld [vmem:[#allocation8 + $0x28] sm:$0xff]  ;;  %v1343_v62 = vld [vmem:[#allocation8 + $0x30] sm:$0xff] }
  0xa1   :  { %4444 = vmatmul.mubr.msk.f32.gmra.mrb[6].mxu0 %vm165_vm1, %v6101_v7  ;;  %4461 = vmatmul.mubr.msk.f32.gmra.mrb[6].mxu1 %vm165_vm1, %v6101_v7  ;;  %v1340_v57 = vld [vmem:[#allocation8 + $0x18] sm:$0xff] }
  0xa2   :  { %4446 = vmatprep.mubr.msk.f32.mxu0 %vm5843_vm0, %v5842_v0  ;;  %4463 = vmatprep.mubr.msk.f32.mxu1 %vm5843_vm0, %v5842_v0  ;;  %v1344_v63 = vld [vmem:[#allocation8 + $0x38] sm:$0xff] }
  0xa5   :  { %4447 = vmatmul.mubr.msk.f32.gmra.mrb[8].mxu0 %vm165_vm1, %v6114_v8  ;;  %4464 = vmatmul.mubr.msk.f32.gmra.mrb[8].mxu1 %vm165_vm1, %v6114_v8 }
  0xa6   :  { %4468 = vmatprep.mubr.msk.f32.mxu0 %vm5843_vm0, %v5842_v0  ;;  %4588 = vmatprep.mubr.msk.f32.mxu1 %vm5843_vm0, %v5842_v0 }
 0x168   :  { %v6129_v15 = vpop.f32.mrb[0].mxu0  ;;  %v337_v16 = vpop.f32.mrb[0].mxu1 }
 0x169   :  { %v4436_v17 = vpop.f32.mrb[1].mxu0  ;;  %4469 = vmatmul.mubr.msk.f32.vlgmr.msra.gmra.mrb[10].mxu0 %vm165_vm1, %v6129_v15  ;;  %v4453_v18 = vpop.f32.mrb[1].mxu1 }
 0x16a   :  { %5156 = vmatpush3.bf16.msra.mxu0 %v5155_v12  ;;  %4487 = vmatprep.mubr.msk.f32.mxu0 %vm5843_vm0, %v5842_v0  ;;  %v4046_v12 = vld [vmem:[%s6609_s3 + $0x18] sm:$0xff]  ;;  %v924_v18 = vld [vmem:[#allocation5 + $0xd8] sm:$0xff] }
 0x16b   :  { %5157 = vmatprep.subr.bf16.mxu0 %v5844_v9  ;;  %v923_v17 = vld [vmem:[#allocation5 + $0xd0] sm:$0xff] }
 0x16c   :  { %v6136_v22 = vpop.f32.mrb[2].mxu0  ;;  %v342_v23 = vpop.f32.mrb[2].mxu1 }
 0x16d   :  { %v4439_v24 = vpop.f32.mrb[3].mxu0  ;;  %v4456_v25 = vpop.f32.mrb[3].mxu1 }
 0x16e   :  { %5159 = vmatpush3.bf16.msra.mxu0 %v5158_v19  ;;  %v5194_v19 = vpack.c.bf16 %v924_v18, %v923_v17  ;;  %v927_v24 = vld [vmem:[#allocation5 + $0xf0] sm:$0xff]  ;;  %v928_v25 = vld [vmem:[#allocation5 + $0xf8] sm:$0xff]  ;;  %v1496_v18 = vld [vmem:[#allocation8 + $0x58] sm:$0xff] }
 0x16f   :  { %5160 = vmatprep.subr.bf16.mxu0 %v5844_v9  ;;  %v1495_v17 = vld [vmem:[#allocation8 + $0x50] sm:$0xff] }
 0x170   :  { %v6139_v29 = vpop.f32.mrb[4].mxu0  ;;  %v6141_v30 = vpop.f32.mrb[4].mxu1 }
 0x171   :  { %v4442_v31 = vpop.f32.mrb[5].mxu0  ;;  %v4459_v32 = vpop.f32.mrb[5].mxu1 }
 0x172   :  { %5162 = vmatpush3.bf16.msra.mxu0 %v5161_v26  ;;  %v5200_v26 = vpack.c.bf16 %v928_v25, %v927_v24  ;;  %v1082_v32 = vld [vmem:[#allocation5 + $0x110] sm:$0xff] }
 0x173   :  { %5163 = vmatprep.subr.bf16.mxu0 %v5844_v9  ;;  %v1498_v24 = vld [vmem:[#allocation8 + $0x68] sm:$0xff] }
 0x174   :  { %v6144_v34 = vpop.f32.mrb[6].mxu0  ;;  %v6146_v35 = vpop.f32.mrb[6].mxu1 }
 0x175   :  { %v4445_v36 = vpop.f32.mrb[7].mxu0  ;;  %v4462_v37 = vpop.f32.mrb[7].mxu1 }
 0x176   :  { %5165 = vmatpush3.bf16.msra.mxu0 %v5164_v33  ;;  %v1083_v33 = vld [vmem:[#allocation5 + $0x118] sm:$0xff]  ;;  %v1085_v37 = vld [vmem:[#allocation5 + $0x128] sm:$0xff] }
 0x177   :  { %4490 = vmatprep.subr.mxu0 %v5842_v0  ;;  %v5206_v36 = vpack.c.bf16 %v1083_v33, %v1082_v32  ;;  %v1576_v33 = vld [vmem:[#allocation7 + $0x10] sm:$0xff] }
 0x178   :  { %v6152_v39 = vpop.f32.mrb[8].mxu0  ;;  %v6154_v40 = vpop.f32.mrb[8].mxu1 }
 0x179   :  { %4488 = vmatmul.mubr.msk.f32.vlgmr.msra.gmra.mrb[10].mxu0 %vm451_vm2, %v337_v16  ;;  %v4448_v41 = vpop.f32.mrb[9].mxu0  ;;  %v4465_v42 = vpop.f32.mrb[9].mxu1  ;;  %v5191_v16 = vpack.c.bf16 %v922_v14, %v921_v13 }
 0x17a   :  { %4491 = vmatpush3.msra.mxu0 %v4040_v38  ;;  %4492 = vmatprep.mubr.msk.f32.mxu0 %vm5843_vm0, %v5842_v0  ;;  %v1086_v41 = vld [vmem:[#allocation5 + $0x130] sm:$0xff]  ;;  %v1087_v42 = vld [vmem:[#allocation5 + $0x138] sm:$0xff] }
 0x17b   :  { %5166 = vmatprep.subr.bf16.mxu0 %v5844_v9  ;;  %v5212_v43 = vpack.c.bf16 %v1087_v42, %v1086_v41  ;;  %v1652_v41 = vld [vmem:[#allocation8 + $0x98] sm:$0xff] }
 0x181   :  { %4493 = vmatmul.mubr.msk.f32.vlgmr.msra.gmra.mrb[10].mxu0 %vm165_vm1, %v6136_v22 }
 0x182   :  { %5168 = vmatpush3.bf16.msra.mxu0 %v5167_v45  ;;  %4511 = vmatprep.mubr.msk.f32.mxu0 %vm5843_vm0, %v5842_v0 }
 0x183   :  { %5169 = vmatprep.subr.bf16.mxu0 %v5844_v9 }
 0x186   :  { %5171 = vmatpush3.bf16.msra.mxu0 %v5170_v48 }
 0x187   :  { %5172 = vmatprep.subr.bf16.mxu0 %v5844_v9 }
 0x18a   :  { %5174 = vmatpush3.bf16.msra.mxu0 %v5173_v51 }
 0x18b   :  { %5175 = vmatprep.subr.bf16.mxu0 %v5844_v9 }
 0x18e   :  { %5177 = vmatpush3.bf16.msra.mxu0 %v5176_v54  ;;  %v1338_v54 = vld [vmem:[#allocation8 + $0x8] sm:$0xff] }
 0x18f   :  { %4514 = vmatprep.subr.mxu0 %v5842_v0 }
 0x191   :  { %4512 = vmatmul.mubr.msk.f32.vlgmr.msra.gmra.mrb[10].mxu0 %vm451_vm2, %v342_v23  ;;  %v5197_v23 = vpack.c.bf16 %v926_v21, %v925_v20  ;;  %v5230_v21 = vpack.c.bf16 %v1496_v18, %v1495_v17 }
 0x192   :  { %4515 = vmatpush3.msra.mxu0 %v4043_v55  ;;  %4516 = vmatprep.mubr.msk.f32.mxu0 %vm5843_vm0, %v5842_v0 }
 0x193   :  { %5178 = vmatprep.subr.bf16.mxu0 %v5844_v9 }
 0x199   :  { %4517 = vmatmul.mubr.msk.f32.vlgmr.msra.gmra.mrb[10].mxu0 %vm165_vm1, %v6139_v29 }
 0x19a   :  { %5180 = vmatpush3.bf16.msra.mxu0 %v5179_v58  ;;  %4535 = vmatprep.mubr.msk.f32.mxu0 %vm5843_vm0, %v5842_v0  ;;  %v5218_v58 = vpack.c.bf16 %v1340_v57, %v1339_v56  ;;  %v1811_v57 = vld [vmem:[#allocation8 + $0xf0] sm:$0xff] }
 0x19b   :  { %5181 = vmatprep.subr.bf16.mxu0 %v5844_v9 }
 0x19e   :  { %5183 = vmatpush3.bf16.msra.mxu0 %v5182_v61  ;;  %v5221_v61 = vpack.c.bf16 %v1342_v60, %v1341_v59  ;;  %v1961_v60 = vld [vmem:[#allocation8 + $0x100] sm:$0xff] }
 0x19f   :  { %5184 = vmatprep.subr.bf16.mxu0 %v5844_v9 }
 0x1a2   :  { %5186 = vmatpush3.bf16.msra.mxu0 %v5185_v1  ;;  %v5224_v1 = vpack.c.bf16 %v1344_v63, %v1343_v62  ;;  %v1963_v63 = vld [vmem:[#allocation8 + $0x110] sm:$0xff] }
 0x1a3   :  { %5187 = vmatprep.subr.bf16.mxu0 %v5844_v9 }
 0x1a6   :  { %5189 = vmatpush3.bf16.msra.mxu0 %v5188_v11  ;;  %v1493_v11 = vld [vmem:[#allocation8 + $0x40] sm:$0xff] }
 0x1a7   :  { %4538 = vmatprep.subr.mxu0 %v5842_v0 }
 0x1a9   :  { %4536 = vmatmul.mubr.msk.f32.vlgmr.msra.gmra.mrb[10].mxu0 %vm451_vm2, %v6141_v30  ;;  %v1081_v30 = vld [vmem:[#allocation5 + $0x108] sm:$0xff] }
 0x1aa   :  { %4539 = vmatpush3.msra.mxu0 %v4046_v12  ;;  %4540 = vmatprep.mubr.msk.f32.mxu0 %vm5843_vm0, %v5842_v0  ;;  %v5203_v31 = vpack.c.bf16 %v1081_v30, %v1080_v28  ;;  %v1494_v12 = vld [vmem:[#allocation8 + $0x48] sm:$0xff]  ;;  %v1499_v28 = vld [vmem:[#allocation8 + $0x70] sm:$0xff]  ;;  %v1500_v30 = vld [vmem:[#allocation8 + $0x78] sm:$0xff] }
 0x1ab   :  { %5190 = vmatprep.subr.bf16.mxu0 %v5844_v9  ;;  %v5236_v32 = vpack.c.bf16 %v1500_v30, %v1499_v28  ;;  %v2244_v28 = vld [vmem:[#allocation10 + $0x8] sm:$0xff] }
 0x1b1   :  { %4541 = vmatmul.mubr.msk.f32.vlgmr.msra.gmra.mrb[10].mxu0 %vm165_vm1, %v6144_v34 }
 0x1b2   :  { %5192 = vmatpush3.bf16.msra.mxu0 %v5191_v16  ;;  %4559 = vmatprep.mubr.msk.f32.mxu0 %vm5843_vm0, %v5842_v0  ;;  %v5227_v16 = vpack.c.bf16 %v1494_v12, %v1493_v11  ;;  %v1967_v12 = vld [vmem:[#allocation8 + $0x130] sm:$0xff] }
 0x1b3   :  { %5193 = vmatprep.subr.bf16.mxu0 %v5844_v9 }
 0x1b6   :  { %5195 = vmatpush3.bf16.msra.mxu0 %v5194_v19 }
 0x1b7   :  { %5196 = vmatprep.subr.bf16.mxu0 %v5844_v9 }
 0x1ba   :  { %5198 = vmatpush3.bf16.msra.mxu0 %v5197_v23  ;;  %v1497_v23 = vld [vmem:[#allocation8 + $0x60] sm:$0xff] }
 0x1bb   :  { %5199 = vmatprep.subr.bf16.mxu0 %v5844_v9 }
 0x1be   :  { %5201 = vmatpush3.bf16.msra.mxu0 %v5200_v26 }
 0x1bf   :  { %4562 = vmatprep.subr.mxu0 %v5842_v0 }
 0x1c1   :  { %4560 = vmatmul.mubr.msk.f32.vlgmr.msra.gmra.mrb[10].mxu0 %vm451_vm2, %v6146_v35  ;;  %v1084_v35 = vld [vmem:[#allocation5 + $0x120] sm:$0xff] }
 0x1c2   :  { %4563 = vmatpush3.msra.mxu0 %v4049_v27  ;;  %4564 = vmatprep.mubr.msk.f32.mxu0 %vm5843_vm0, %v5842_v0  ;;  %v5209_v38 = vpack.c.bf16 %v1085_v37, %v1084_v35  ;;  %v5233_v27 = vpack.c.bf16 %v1498_v24, %v1497_v23  ;;  %v1650_v35 = vld [vmem:[#allocation8 + $0x88] sm:$0xff] }
 0x1c3   :  { %5202 = vmatprep.subr.bf16.mxu0 %v5844_v9 }
 0x1c9   :  { %4565 = vmatmul.mubr.msk.f32.vlgmr.msra.gmra.mrb[10].mxu0 %vm165_vm1, %v6152_v39 }
 0x1ca   :  { %5204 = vmatpush3.bf16.msra.mxu0 %v5203_v31  ;;  %4583 = vmatprep.mubr.msk.f32.mxu0 %vm5843_vm0, %v5842_v0 }
 0x1cb   :  { %5205 = vmatprep.subr.bf16.mxu0 %v5844_v9 }
 0x1ce   :  { %5207 = vmatpush3.bf16.msra.mxu0 %v5206_v36  ;;  %v1649_v36 = vld [vmem:[#allocation8 + $0x80] sm:$0xff] }
 0x1cf   :  { %5208 = vmatprep.subr.bf16.mxu0 %v5844_v9  ;;  %v5239_v37 = vpack.c.bf16 %v1650_v35, %v1649_v36  ;;  %v2247_v36 = vld [vmem:[#allocation10 + $0x20] sm:$0xff]  ;;  %v2248_v35 = vld [vmem:[#allocation10 + $0x28] sm:$0xff] }
 0x1d2   :  { %5210 = vmatpush3.bf16.msra.mxu0 %v5209_v38  ;;  %v1651_v38 = vld [vmem:[#allocation8 + $0x90] sm:$0xff] }
 0x1d3   :  { %5211 = vmatprep.subr.bf16.mxu0 %v5844_v9  ;;  %v5242_v42 = vpack.c.bf16 %v1652_v41, %v1651_v38  ;;  %v2250_v38 = vld [vmem:[#allocation10 + $0x38] sm:$0xff] }
 0x1d6   :  { %5213 = vmatpush3.bf16.msra.mxu0 %v5212_v43  ;;  %v1653_v43 = vld [vmem:[#allocation8 + $0xa0] sm:$0xff] }
 0x1d7   :  { %4740 = vmatprep.subr.mxu0 %v5842_v0 }
 0x1d9   :  { %4584 = vmatmul.mubr.msk.f32.vlgmr.msra.gmra.mrb[10].mxu0 %vm451_vm2, %v6154_v40 }
 0x1da   :  { %4742 = vmatprep.mubr.msk.f32.mxu0 %vm5843_vm0, %v5842_v0 }
 0x2ac   :  { %v1157_v45 = vpop.f32.mrb[10].mxu0 }
 0x2ad   :  { %v5514_v46 = vadd.f32 %v4038_v44, %v1157_v45  ;;  %v4585_v47 = vpop.f32.mrb[11].mxu0  ;;  %v1654_v44 = vld [vmem:[#allocation8 + $0xa8] sm:$0xff] }
 0x2ae   :  { %v5245_v45 = vpack.c.bf16 %v1654_v44, %v1653_v43  ;;  %v1656_v47 = vld [vmem:[#allocation8 + $0xb8] sm:$0xff] }
 0x2af   :  { %v1162_v48 = vsub.f32 0.0, %v5514_v46  ;;  %v1655_v46 = vld [vmem:[#allocation8 + $0xb0] sm:$0xff] }
 0x2b1   :  { %v1163_v49 = vmul.f32 1.442695, %v1162_v48  ;;  %v5248_v48 = vpack.c.bf16 %v1656_v47, %v1655_v46  ;;  %v2331_v47 = vld [vmem:[#allocation11] sm:$0xff] }
 0x2b3   :  { %5605 = vpow2.f32 %v1163_v49  ;;  %v1805_v49 = vld [vmem:[#allocation8 + $0xc0] sm:$0xff] }
 0x2bd   :  { %v5606_v50 = vpop.eup %5605 }
 0x2be   :  { %v1165_v51 = vadd.f32 1.0, %v5606_v50  ;;  %v1806_v50 = vld [vmem:[#allocation8 + $0xc8] sm:$0xff] }
 0x2c0   :  { %5607 = vrcp.f32 %v1165_v51  ;;  %v5251_v51 = vpack.c.bf16 %v1806_v50, %v1805_v49  ;;  %v2333_v49 = vld [vmem:[#allocation11 + $0x10] sm:$0xff]  ;;  %v2334_v50 = vld [vmem:[#allocation11 + $0x18] sm:$0xff] }
 0x2ca   :  { %v6222_v52 = vpop.eup %5607 }
 0x2cb   :  { %v1167_v40 = vmul.f32 %v6222_v52, %v6058_v3  ;;  %v1337_v3 = vld [vmem:[#allocation8] sm:$0xff]  ;;  %v2049_v23 = vsub.f32 1.0, %v6222_v52 }
 0x2cc   :  { %v5215_v55 = vpack.c.bf16 %v1338_v54, %v1337_v3  ;;  %v1809_v54 = vld [vmem:[#allocation8 + $0xe0] sm:$0xff] }
 0x2cd   :  { %4587 = vmatpush3.msra.mxu1 %v1167_v40  ;;  %v1807_v40 = vld [vmem:[#allocation8 + $0xd0] sm:$0xff] }
 0x2ce   :  { %4589 = vmatmul.mubr.msk.f32.vlgmr.msra.gmra.mrb[10].mxu1 %vm165_vm1, %v6053_v2  ;;  %4603 = vmatprep.subr.mxu1 %v5842_v0 }
 0x2cf   :  { %4591 = vmatprep.mubr.msk.f32.mxu1 %vm5843_vm0, %v5842_v0  ;;  %4604 = vmatpush3.msra.mxu1 %v1259_v53  ;;  %v1808_v53 = vld [vmem:[#allocation8 + $0xd8] sm:$0xff] }
 0x2d0   :  { %5214 = vmatprep.subr.bf16.mxu1 %v5844_v9  ;;  %v5254_v3 = vpack.c.bf16 %v1808_v53, %v1807_v40  ;;  %v5290_v40 = vpack.c.bf16 %v2334_v50, %v2333_v49  ;;  %v2335_v53 = vld [vmem:[#allocation11 + $0x20] sm:$0xff]  ;;  %v2664_v49 = vld [vmem:[#allocation11 + $0x88] sm:$0xff] }
 0x2d2   :  { %4592 = vmatmul.mubr.msk.f32.gmra.mrb[12].mxu1 %vm165_vm1, %v6073_v5 }
 0x2d3   :  { %4594 = vmatprep.mubr.msk.f32.mxu1 %vm5843_vm0, %v5842_v0 }
 0x2d6   :  { %4595 = vmatmul.mubr.msk.f32.gmra.mrb[14].mxu1 %vm165_vm1, %v6088_v6 }
 0x2d7   :  { %4597 = vmatprep.mubr.msk.f32.mxu1 %vm5843_vm0, %v5842_v0 }
 0x2da   :  { %4598 = vmatmul.mubr.msk.f32.gmra.mrb[16].mxu1 %vm165_vm1, %v6101_v7 }
 0x2db   :  { %4600 = vmatprep.mubr.msk.f32.mxu1 %vm5843_vm0, %v5842_v0 }
 0x2de   :  { %4601 = vmatmul.mubr.msk.f32.gmra.mrb[18].mxu1 %vm165_vm1, %v6114_v8 }
 0x2df   :  { %4605 = vmatprep.mubr.msk.f32.mxu1 %vm5843_vm0, %v5842_v0 }
 0x2e2   :  { %4606 = vmatmul.mubr.msk.f32.vlgmr.msra.gmra.mrb[20].mxu1 %vm165_vm1, %v6129_v15  ;;  %v1420_v15 = vld [vmem:[#allocation7 + $0x8] sm:$0xff] }
 0x2e3   :  { %5216 = vmatpush3.bf16.msra.mxu1 %v5215_v55  ;;  %4624 = vmatprep.mubr.msk.f32.mxu1 %vm5843_vm0, %v5842_v0  ;;  %v1810_v55 = vld [vmem:[#allocation8 + $0xe8] sm:$0xff] }
 0x2e4   :  { %5217 = vmatprep.subr.bf16.mxu1 %v5844_v9  ;;  %v5257_v56 = vpack.c.bf16 %v1810_v55, %v1809_v54 }
 0x2e7   :  { %5219 = vmatpush3.bf16.msra.mxu1 %v5218_v58  ;;  %v1812_v58 = vld [vmem:[#allocation8 + $0xf8] sm:$0xff] }
 0x2e8   :  { %5220 = vmatprep.subr.bf16.mxu1 %v5844_v9  ;;  %v5260_v59 = vpack.c.bf16 %v1812_v58, %v1811_v57  ;;  %v2337_v57 = vld [vmem:[#allocation11 + $0x30] sm:$0xff]  ;;  %v2338_v58 = vld [vmem:[#allocation11 + $0x38] sm:$0xff] }
 0x2eb   :  { %5222 = vmatpush3.bf16.msra.mxu1 %v5221_v61  ;;  %v1962_v61 = vld [vmem:[#allocation8 + $0x108] sm:$0xff] }
 0x2ec   :  { %5223 = vmatprep.subr.bf16.mxu1 %v5844_v9  ;;  %v5263_v62 = vpack.c.bf16 %v1962_v61, %v1961_v60  ;;  %v5296_v60 = vpack.c.bf16 %v2338_v58, %v2337_v57  ;;  %v2414_v61 = vld [vmem:[#allocation10 + $0x40] sm:$0xff]  ;;  %v2669_v57 = vld [vmem:[#allocation11 + $0xb0] sm:$0xff]  ;;  %v2670_v58 = vld [vmem:[#allocation11 + $0xb8] sm:$0xff] }
 0x2ef   :  { %5225 = vmatpush3.bf16.msra.mxu1 %v5224_v1  ;;  %v1964_v1 = vld [vmem:[#allocation8 + $0x118] sm:$0xff] }
 0x2f0   :  { %4627 = vmatprep.subr.mxu1 %v5842_v0 }
 0x3a1   :  { %v1234_v4 = vpop.f32.mrb[10].mxu1 }
 0x3a2   :  { %v4590_v10 = vpop.f32.mrb[11].mxu1  ;;  %4625 = vmatmul.mubr.msk.f32.vlgmr.msra.gmra.mrb[20].mxu1 %vm451_vm2, %v1234_v4  ;;  %v1965_v4 = vld [vmem:[#allocation8 + $0x120] sm:$0xff] }
 0x3a3   :  { %4628 = vmatpush3.msra.mxu1 %v1420_v15  ;;  %4629 = vmatprep.mubr.msk.f32.mxu1 %vm5843_vm0, %v5842_v0  ;;  %v5266_v15 = vpack.c.bf16 %v1964_v1, %v1963_v63  ;;  %v1966_v10 = vld [vmem:[#allocation8 + $0x128] sm:$0xff] }
 0x3a4   :  { %5226 = vmatprep.subr.bf16.mxu1 %v5844_v9  ;;  %v5269_v11 = vpack.c.bf16 %v1966_v10, %v1965_v4  ;;  %v2416_v10 = vld [vmem:[#allocation10 + $0x50] sm:$0xff] }
 0x3a5   :  { %v1239_v13 = vpop.f32.mrb[12].mxu1 }
 0x3a6   :  { %v4593_v14 = vpop.f32.mrb[13].mxu1 }
 0x3a9   :  { %v1244_v19 = vpop.f32.mrb[14].mxu1 }
 0x3aa   :  { %4630 = vmatmul.mubr.msk.f32.vlgmr.msra.gmra.mrb[20].mxu1 %vm165_vm1, %v6136_v22  ;;  %v4596_v20 = vpop.f32.mrb[15].mxu1 }
 0x3ab   :  { %5228 = vmatpush3.bf16.msra.mxu1 %v5227_v16  ;;  %4648 = vmatprep.mubr.msk.f32.mxu1 %vm5843_vm0, %v5842_v0  ;;  %v6320_v20 = vld [vmem:[%s6607_s1 + $0x8] sm:$0xff] }
 0x3ac   :  { %5229 = vmatprep.subr.bf16.mxu1 %v5844_v9  ;;  %4741 = vmatpush3.msra.mxu0 %v6320_v20 }
 0x3ad   :  { %v6265_v25 = vpop.f32.mrb[16].mxu1  ;;  %4743 = vmatmul.mubr.msk.f32.vlgmr.msra.gmra.mrb[12].mxu0 %vm165_vm1, %v6053_v2  ;;  %4947 = vmatprep.subr.mxu0 %v5842_v0 }
 0x3ae   :  { %v4599_v26 = vpop.f32.mrb[17].mxu1  ;;  %4745 = vmatprep.mubr.msk.f32.mxu0 %vm5843_vm0, %v5842_v0 }
 0x3af   :  { %5231 = vmatpush3.bf16.msra.mxu1 %v5230_v21  ;;  %v2046_v21 = vpop.permute.xlu0 %2045 }
 0x3b0   :  { %5232 = vmatprep.subr.bf16.mxu1 %v5844_v9 }
 0x3b1   :  { %v6268_v22 = vpop.f32.mrb[18].mxu1  ;;  %4746 = vmatmul.mubr.msk.f32.gmra.mrb[14].mxu0 %vm165_vm1, %v6073_v5 }
 0x3b2   :  { %v4602_v31 = vpop.f32.mrb[19].mxu1  ;;  %4748 = vmatprep.mubr.msk.f32.mxu0 %vm5843_vm0, %v5842_v0 }
 0x3b3   :  { %5234 = vmatpush3.bf16.msra.mxu1 %v5233_v27  ;;  %v2245_v31 = vld [vmem:[#allocation10 + $0x10] sm:$0xff] }
 0x3b4   :  { %5235 = vmatprep.subr.bf16.mxu1 %v5844_v9 }
 0x3b5   :  { %4749 = vmatmul.mubr.msk.f32.gmra.mrb[16].mxu0 %vm165_vm1, %v6088_v6 }
 0x3b6   :  { %4751 = vmatprep.mubr.msk.f32.mxu0 %vm5843_vm0, %v5842_v0 }
 0x3b7   :  { %5237 = vmatpush3.bf16.msra.mxu1 %v5236_v32  ;;  %v2246_v32 = vld [vmem:[#allocation10 + $0x18] sm:$0xff] }
 0x3b8   :  { %4651 = vmatprep.subr.mxu1 %v5842_v0 }
 0x3b9   :  { %4752 = vmatmul.mubr.msk.f32.gmra.mrb[18].mxu0 %vm165_vm1, %v6101_v7 }
 0x3ba   :  { %4649 = vmatmul.mubr.msk.f32.vlgmr.msra.gmra.mrb[20].mxu1 %vm451_vm2, %v1239_v13  ;;  %v1968_v13 = vld [vmem:[#allocation8 + $0x138] sm:$0xff]  ;;  %4754 = vmatprep.mubr.msk.f32.mxu0 %vm5843_vm0, %v5842_v0 }
 0x3bb   :  { %4652 = vmatpush3.msra.mxu1 %v1576_v33  ;;  %4653 = vmatprep.mubr.msk.f32.mxu1 %vm5843_vm0, %v5842_v0  ;;  %v5272_v14 = vpack.c.bf16 %v1968_v13, %v1967_v12  ;;  %v5278_v33 = vpack.c.bf16 %v2246_v32, %v2245_v31  ;;  %v2502_v31 = vld [vmem:[#allocation11 + $0x68] sm:$0xff] }
 0x3bc   :  { %5238 = vmatprep.subr.bf16.mxu1 %v5844_v9 }
 0x3bd   :  { %4755 = vmatmul.mubr.msk.f32.gmra.mrb[20].mxu0 %vm165_vm1, %v6114_v8 }
 0x3be   :  { %4949 = vmatprep.mubr.msk.f32.mxu0 %vm5843_vm0, %v5842_v0 }
 0x3c2   :  { %4654 = vmatmul.mubr.msk.f32.vlgmr.msra.gmra.mrb[20].mxu1 %vm165_vm1, %v6139_v29  ;;  %v1732_v29 = vld [vmem:[#allocation7 + $0x18] sm:$0xff] }
 0x3c3   :  { %5240 = vmatpush3.bf16.msra.mxu1 %v5239_v37  ;;  %4672 = vmatprep.mubr.msk.f32.mxu1 %vm5843_vm0, %v5842_v0  ;;  %v5281_v37 = vpack.c.bf16 %v2248_v35, %v2247_v36  ;;  %v2504_v36 = vld [vmem:[#allocation11 + $0x78] sm:$0xff] }
 0x3c4   :  { %5241 = vmatprep.subr.bf16.mxu1 %v5844_v9 }
 0x3c7   :  { %5243 = vmatpush3.bf16.msra.mxu1 %v5242_v42 }
 0x3c8   :  { %5244 = vmatprep.subr.bf16.mxu1 %v5844_v9 }
 0x3cb   :  { %5246 = vmatpush3.bf16.msra.mxu1 %v5245_v45 }
 0x3cc   :  { %5247 = vmatprep.subr.bf16.mxu1 %v5844_v9 }
 0x3cf   :  { %5249 = vmatpush3.bf16.msra.mxu1 %v5248_v48  ;;  %v2332_v48 = vld [vmem:[#allocation11 + $0x8] sm:$0xff] }
 0x3d0   :  { %4675 = vmatprep.subr.mxu1 %v5842_v0 }
 0x3d2   :  { %4673 = vmatmul.mubr.msk.f32.vlgmr.msra.gmra.mrb[20].mxu1 %vm451_vm2, %v1244_v19 }
 0x3d3   :  { %4676 = vmatpush3.msra.mxu1 %v1732_v29  ;;  %4677 = vmatprep.mubr.msk.f32.mxu1 %vm5843_vm0, %v5842_v0  ;;  %v5287_v29 = vpack.c.bf16 %v2332_v48, %v2331_v47  ;;  %v2586_v47 = vld [vmem:[#allocation10 + $0xb0] sm:$0xff]  ;;  %v2587_v48 = vld [vmem:[#allocation10 + $0xb8] sm:$0xff] }
 0x3d4   :  { %5250 = vmatprep.subr.bf16.mxu1 %v5844_v9 }
 0x3da   :  { %4678 = vmatmul.mubr.msk.f32.vlgmr.msra.gmra.mrb[20].mxu1 %vm165_vm1, %v6144_v34  ;;  %v1888_v34 = vld [vmem:[#allocation7 + $0x20] sm:$0xff] }
 0x3db   :  { %5252 = vmatpush3.bf16.msra.mxu1 %v5251_v51  ;;  %4696 = vmatprep.mubr.msk.f32.mxu1 %vm5843_vm0, %v5842_v0 }
 0x3dc   :  { %5253 = vmatprep.subr.bf16.mxu1 %v5844_v9 }
 0x3df   :  { %5255 = vmatpush3.bf16.msra.mxu1 %v5254_v3  ;;  %v2336_v3 = vld [vmem:[#allocation11 + $0x28] sm:$0xff] }
 0x3e0   :  { %5256 = vmatprep.subr.bf16.mxu1 %v5844_v9 }
 0x3e3   :  { %5258 = vmatpush3.bf16.msra.mxu1 %v5257_v56  ;;  %v5293_v56 = vpack.c.bf16 %v2336_v3, %v2335_v53  ;;  %v2667_v3 = vld [vmem:[#allocation11 + $0xa0] sm:$0xff] }
 0x3e4   :  { %5259 = vmatprep.subr.bf16.mxu1 %v5844_v9 }
 0x3e7   :  { %5261 = vmatpush3.bf16.msra.mxu1 %v5260_v59 }
 0x3e8   :  { %4699 = vmatprep.subr.mxu1 %v5842_v0 }
 0x3ea   :  { %4697 = vmatmul.mubr.msk.f32.vlgmr.msra.gmra.mrb[20].mxu1 %vm451_vm2, %v6265_v25  ;;  %v2048_v25 = vmul.f32 %v6222_v52, %v2046_v21  ;;  %v2243_v52 = vld [vmem:[#allocation10] sm:$0xff]  ;;  %v2421_v21 = vld [vmem:[#allocation10 + $0x78] sm:$0xff] }
 0x3eb   :  { %4700 = vmatpush3.msra.mxu1 %v1888_v34  ;;  %4701 = vmatprep.mubr.msk.f32.mxu1 %vm5843_vm0, %v5842_v0  ;;  %v5275_v30 = vpack.c.bf16 %v2244_v28, %v2243_v52  ;;  %v2500_v52 = vld [vmem:[#allocation11 + $0x58] sm:$0xff] }
 0x3ec   :  { %5262 = vmatprep.subr.bf16.mxu1 %v5844_v9 }
 0x3f2   :  { %4702 = vmatmul.mubr.msk.f32.vlgmr.msra.gmra.mrb[20].mxu1 %vm165_vm1, %v6152_v39  ;;  %v4058_v39 = vld [vmem:[%s6614_s8] ss:$0 sm:$0xff] }
 0x3f3   :  { %5264 = vmatpush3.bf16.msra.mxu1 %v5263_v62  ;;  %4720 = vmatprep.mubr.msk.f32.mxu1 %vm5843_vm0, %v5842_v0  ;;  %v2415_v62 = vld [vmem:[#allocation10 + $0x48] sm:$0xff] }
 0x3f4   :  { %5265 = vmatprep.subr.bf16.mxu1 %v5844_v9 }
 0x3f7   :  { %5267 = vmatpush3.bf16.msra.mxu1 %v5266_v15  ;;  %v5299_v15 = vpack.c.bf16 %v2415_v62, %v2414_v61  ;;  %v2747_v61 = vld [vmem:[#allocation10 + $0xc8] sm:$0xff] }
 0x3f8   :  { %5268 = vmatprep.subr.bf16.mxu1 %v5844_v9 }
 0x3fb   :  { %5270 = vmatpush3.bf16.msra.mxu1 %v5269_v11  ;;  %v2417_v11 = vld [vmem:[#allocation10 + $0x58] sm:$0xff] }
 0x3fc   :  { %5271 = vmatprep.subr.bf16.mxu1 %v5844_v9 }
 0x3ff   :  { %5273 = vmatpush3.bf16.msra.mxu1 %v5272_v14 }
 0x400   :  { %4723 = vmatprep.subr.mxu1 %v5842_v0 }
 0x402   :  { %4721 = vmatmul.mubr.msk.f32.vlgmr.msra.gmra.mrb[20].mxu1 %vm451_vm2, %v6268_v22 }
 0x403   :  { %4725 = vmatprep.mubr.msk.f32.mxu1 %vm5843_vm0, %v5842_v0 }
 0x4d5   :  { %v2038_v16 = vpop.f32.mrb[20].mxu1 }
 0x4d6   :  { %v5515_v17 = vadd.f32 %v4058_v39, %v2038_v16  ;;  %v4722_v18 = vpop.f32.mrb[21].mxu1  ;;  %v5302_v39 = vpack.c.bf16 %v2417_v11, %v2416_v10  ;;  %v2418_v16 = vld [vmem:[#allocation10 + $0x60] sm:$0xff] }
 0x4d7   :  { %v2750_v11 = vld [vmem:[#allocation10 + $0xe0] sm:$0xff] }
 0x4d8   :  { %5609 = vtanh.f32 %v5515_v17  ;;  %v2419_v17 = vld [vmem:[#allocation10 + $0x68] sm:$0xff] }
 0x4d9   :  { %v5305_v18 = vpack.c.bf16 %v2419_v17, %v2418_v16  ;;  %v2753_v16 = vld [vmem:[#allocation10 + $0xf8] sm:$0xff] }
 0x4e2   :  { %v5610_v19 = vpop.eup %5609 }
 0x4e3   :  { %2051 = vrot.lane.b32.xlu0 %v5610_v19, %s5845_s25  ;;  %v2420_v19 = vld [vmem:[#allocation10 + $0x70] sm:$0xff] }
 0x555   :  { %v2052_v24 = vpop.permute.xlu0 %2051 }
 0x556   :  { %v2054_v26 = vmul.f32 %v2052_v24, %v2049_v23  ;;  %v5308_v23 = vpack.c.bf16 %v2421_v21, %v2420_v19  ;;  %v2497_v24 = vld [vmem:[#allocation11 + $0x40] sm:$0xff]  ;;  %v2831_v21 = vld [vmem:[#allocation11 + $0xd0] sm:$0xff] }
 0x558   :  { %v2055_v27 = vadd.f32 %v2054_v26, %v2048_v25  ;;  %v2498_v25 = vld [vmem:[#allocation11 + $0x48] sm:$0xff] }
 0x559   :  { %v5311_v26 = vpack.c.bf16 %v2498_v25, %v2497_v24  ;;  %v2833_v25 = vld [vmem:[#allocation11 + $0xe0] sm:$0xff] }
 0x55a   :  { %2059 = vrot.lane.b32.xlu1 %v2055_v27, %s5845_s25  ;;  %v2499_v27 = vld [vmem:[#allocation11 + $0x50] sm:$0xff] }
 0x55b   :  { %v5314_v28 = vpack.c.bf16 %v2500_v52, %v2499_v27  ;;  %v2835_v52 = vld [vmem:[#allocation11 + $0xf0] sm:$0xff] }
 0x55e   :  { %3995 = vrot.lane.b32.xlu1 %v6320_v20, %s5845_s25 }
 0x5cc   :  { %v6349_v22 = vpop.permute.xlu1 %2059 }
 0x5cd   :  { %4724 = vmatpush3.msra.mxu1 %v6349_v22 }
 0x5ce   :  { %4726 = vmatmul.mubr.msk.f32.vlgmr.msra.gmra.mrb[22].mxu1 %vm165_vm1, %v6053_v2  ;;  %5274 = vmatprep.subr.bf16.mxu1 %v5844_v9  ;;  %v2249_v2 = vld [vmem:[#allocation10 + $0x30] sm:$0xff] }
 0x5cf   :  { %4728 = vmatprep.mubr.msk.f32.mxu1 %vm5843_vm0, %v5842_v0  ;;  %5276 = vmatpush3.bf16.msra.mxu1 %v5275_v30  ;;  %v5284_v41 = vpack.c.bf16 %v2250_v38, %v2249_v2  ;;  %v2501_v30 = vld [vmem:[#allocation11 + $0x60] sm:$0xff]  ;;  %v2581_v2 = vld [vmem:[#allocation10 + $0x88] sm:$0xff] }
 0x5d0   :  { %5277 = vmatprep.subr.bf16.mxu1 %v5844_v9  ;;  %v5317_v32 = vpack.c.bf16 %v2502_v31, %v2501_v30  ;;  %v2912_v31 = vld [vmem:[#allocation10 + $0x100] sm:$0xff] }
 0x5d2   :  { %4729 = vmatmul.mubr.msk.f32.gmra.mrb[24].mxu1 %vm165_vm1, %v6073_v5  ;;  %v2218_v5 = vpop.f32.mrb[12].mxu0 }
 0x5d3   :  { %4731 = vmatprep.mubr.msk.f32.mxu1 %vm5843_vm0, %v5842_v0  ;;  %5279 = vmatpush3.bf16.msra.mxu1 %v5278_v33  ;;  %v2503_v33 = vld [vmem:[#allocation11 + $0x70] sm:$0xff] }
 0x5d4   :  { %5280 = vmatprep.subr.bf16.mxu1 %v5844_v9  ;;  %v5320_v35 = vpack.c.bf16 %v2504_v36, %v2503_v33  ;;  %v2914_v36 = vld [vmem:[#allocation10 + $0x110] sm:$0xff] }
 0x5d6   :  { %4732 = vmatmul.mubr.msk.f32.gmra.mrb[26].mxu1 %vm165_vm1, %v6088_v6  ;;  %v4744_v6 = vpop.f32.mrb[13].mxu0 }
 0x5d7   :  { %4734 = vmatprep.mubr.msk.f32.mxu1 %vm5843_vm0, %v5842_v0  ;;  %5282 = vmatpush3.bf16.msra.mxu1 %v5281_v37  ;;  %v6377_v42 = vpop.f32.mrb[14].mxu0  ;;  %v2580_v37 = vld [vmem:[#allocation10 + $0x80] sm:$0xff] }
 0x5d8   :  { %5283 = vmatprep.subr.bf16.mxu1 %v5844_v9  ;;  %v4747_v43 = vpop.f32.mrb[15].mxu0  ;;  %v5323_v38 = vpack.c.bf16 %v2581_v2, %v2580_v37  ;;  %v2916_v2 = vld [vmem:[#allocation10 + $0x120] sm:$0xff] }
 0x5d9   :  { %v6379_v44 = vpop.f32.mrb[16].mxu0  ;;  %v2584_v43 = vld [vmem:[#allocation10 + $0xa0] sm:$0xff] }
 0x5da   :  { %4735 = vmatmul.mubr.msk.f32.gmra.mrb[28].mxu1 %vm165_vm1, %v6101_v7  ;;  %v4750_v7 = vpop.f32.mrb[17].mxu0 }
 0x5db   :  { %4737 = vmatprep.mubr.msk.f32.mxu1 %vm5843_vm0, %v5842_v0  ;;  %5285 = vmatpush3.bf16.msra.mxu1 %v5284_v41  ;;  %v6381_v45 = vpop.f32.mrb[18].mxu0  ;;  %v2582_v41 = vld [vmem:[#allocation10 + $0x90] sm:$0xff]  ;;  %v2585_v7 = vld [vmem:[#allocation10 + $0xa8] sm:$0xff] }
 0x5dc   :  { %5286 = vmatprep.subr.bf16.mxu1 %v5844_v9  ;;  %v4753_v46 = vpop.f32.mrb[19].mxu0 }
 0x5dd   :  { %v6398_v4 = vpop.f32.mrb[20].mxu0  ;;  %v5329_v46 = vpack.c.bf16 %v2585_v7, %v2584_v43  ;;  %v2996_v7 = vld [vmem:[#allocation11 + $0x108] sm:$0xff] }
 0x5de   :  { %4738 = vmatmul.mubr.msk.f32.gmra.mrb[30].mxu1 %vm165_vm1, %v6114_v8  ;;  %v4756_v12 = vpop.f32.mrb[21].mxu0 }
 0x5df   :  { %4773 = vmatprep.mubr.msk.f32.mxu1 %vm5843_vm0, %v5842_v0  ;;  %v2751_v12 = vld [vmem:[#allocation10 + $0xe8] sm:$0xff] }
 0x6a1   :  { %v6383_v8 = vpop.f32.mrb[22].mxu1 }
 0x6a2   :  { %v4727_v51 = vpop.f32.mrb[23].mxu1  ;;  %4774 = vmatmul.mubr.msk.f32.vlgmr.msra.gmra.mrb[32].mxu1 %vm451_vm2, %v6383_v8 }
 0x6a3   :  { %5288 = vmatpush3.bf16.msra.mxu1 %v5287_v29  ;;  %4792 = vmatprep.mubr.msk.f32.mxu1 %vm5843_vm0, %v5842_v0  ;;  %v5332_v29 = vpack.c.bf16 %v2587_v48, %v2586_v47  ;;  %v2665_v51 = vld [vmem:[#allocation11 + $0x90] sm:$0xff]  ;;  %v2998_v48 = vld [vmem:[#allocation11 + $0x118] sm:$0xff] }
 0x6a4   :  { %5289 = vmatprep.subr.bf16.mxu1 %v5844_v9  ;;  %v2997_v47 = vld [vmem:[#allocation11 + $0x110] sm:$0xff] }
 0x6a5   :  { %v6390_v54 = vpop.f32.mrb[24].mxu1 }
 0x6a6   :  { %v4730_v55 = vpop.f32.mrb[25].mxu1 }
 0x6a7   :  { %5291 = vmatpush3.bf16.msra.mxu1 %v5290_v40  ;;  %v2666_v40 = vld [vmem:[#allocation11 + $0x98] sm:$0xff]  ;;  %v2668_v55 = vld [vmem:[#allocation11 + $0xa8] sm:$0xff] }
 0x6a8   :  { %5292 = vmatprep.subr.bf16.mxu1 %v5844_v9  ;;  %v5338_v53 = vpack.c.bf16 %v2666_v40, %v2665_v51  ;;  %v3001_v51 = vld [vmem:[#allocation11 + $0x130] sm:$0xff]  ;;  %v3002_v40 = vld [vmem:[#allocation11 + $0x138] sm:$0xff] }
 0x6a9   :  { %v6393_v59 = vpop.f32.mrb[26].mxu1 }
 0x6aa   :  { %v4733_v34 = vpop.f32.mrb[27].mxu1 }
 0x6ab   :  { %5294 = vmatpush3.bf16.msra.mxu1 %v5293_v56  ;;  %v5341_v56 = vpack.c.bf16 %v2668_v55, %v2667_v3  ;;  %v5344_v34 = vpack.c.bf16 %v2670_v58, %v2669_v57  ;;  %v4080_v3 = vld [vmem:[%s6619_s13] ss:$0 sm:$0xff] }
 0x6ac   :  { %5295 = vmatprep.subr.bf16.mxu1 %v5844_v9 }
 0x6ad   :  { %v6396_v63 = vpop.f32.mrb[28].mxu1 }
 0x6ae   :  { %v4736_v1 = vpop.f32.mrb[29].mxu1 }
 0x6af   :  { %5297 = vmatpush3.bf16.msra.mxu1 %v5296_v60  ;;  %v2746_v60 = vld [vmem:[#allocation10 + $0xc0] sm:$0xff]  ;;  %v2748_v1 = vld [vmem:[#allocation10 + $0xd0] sm:$0xff] }
 0x6b0   :  { %5298 = vmatprep.subr.bf16.mxu1 %v5844_v9  ;;  %v5347_v62 = vpack.c.bf16 %v2747_v61, %v2746_v60 }
 0x6b1   :  { %v6401_v13 = vpop.f32.mrb[30].mxu1 }
 0x6b2   :  { %4793 = vmatmul.mubr.msk.f32.vlgmr.msra.gmra.mrb[32].mxu1 %vm451_vm2, %v2218_v5  ;;  %v4739_v14 = vpop.f32.mrb[31].mxu1  ;;  %v2583_v5 = vld [vmem:[#allocation10 + $0x98] sm:$0xff] }
 0x6b3   :  { %5300 = vmatpush3.bf16.msra.mxu1 %v5299_v15  ;;  %4811 = vmatprep.mubr.msk.f32.mxu1 %vm5843_vm0, %v5842_v0  ;;  %v5326_v6 = vpack.c.bf16 %v2583_v5, %v2582_v41  ;;  %v2749_v15 = vld [vmem:[#allocation10 + $0xd8] sm:$0xff]  ;;  %v5353_v14 = vpack.c.bf16 %v2751_v12, %v2750_v11  ;;  %v2918_v5 = vld [vmem:[#allocation10 + $0x130] sm:$0xff] }
 0x6b4   :  { %5301 = vmatprep.subr.bf16.mxu1 %v5844_v9  ;;  %v5350_v10 = vpack.c.bf16 %v2749_v15, %v2748_v1  ;;  %v3175_v1 = vld [vmem:[#allocation13 + $0x8] sm:$0xff]  ;;  %v3176_v11 = vld [vmem:[#allocation13 + $0x10] sm:$0xff]  ;;  %v3177_v12 = vld [vmem:[#allocation13 + $0x18] sm:$0xff] }
 0x6b7   :  { %5303 = vmatpush3.bf16.msra.mxu1 %v5302_v39  ;;  %v2752_v39 = vld [vmem:[#allocation10 + $0xf0] sm:$0xff] }
 0x6b8   :  { %5304 = vmatprep.subr.bf16.mxu1 %v5844_v9  ;;  %v5356_v17 = vpack.c.bf16 %v2753_v16, %v2752_v39  ;;  %v5398_v39 = vpack.c.bf16 %v3177_v12, %v3176_v11  ;;  %v3179_v16 = vld [vmem:[#allocation13 + $0x28] sm:$0xff]  ;;  %v3428_v12 = vld [vmem:[#allocation14 + $0x70] sm:$0xff] }
 0x6bb   :  { %5306 = vmatpush3.bf16.msra.mxu1 %v5305_v18  ;;  %v2830_v18 = vld [vmem:[#allocation11 + $0xc8] sm:$0xff] }
 0x6bc   :  { %5307 = vmatprep.subr.bf16.mxu1 %v5844_v9 }
 0x6bf   :  { %5309 = vmatpush3.bf16.msra.mxu1 %v5308_v23  ;;  %v2832_v23 = vld [vmem:[#allocation11 + $0xd8] sm:$0xff] }
 0x6c0   :  { %5310 = vmatprep.subr.bf16.mxu1 %v5844_v9  ;;  %v5362_v24 = vpack.c.bf16 %v2832_v23, %v2831_v21  ;;  %v5619_v21 = vld [vmem:[%s6608_s2 + $0x10] sm:$0xff] }
 0x6c2   :  { %4812 = vmatmul.mubr.msk.f32.vlgmr.msra.gmra.mrb[32].mxu1 %vm451_vm2, %v6390_v54 }
 0x6c3   :  { %5312 = vmatpush3.bf16.msra.mxu1 %v5311_v26  ;;  %4830 = vmatprep.mubr.msk.f32.mxu1 %vm5843_vm0, %v5842_v0  ;;  %v2834_v26 = vld [vmem:[#allocation11 + $0xe8] sm:$0xff] }
 0x6c4   :  { %5313 = vmatprep.subr.bf16.mxu1 %v5844_v9  ;;  %v5365_v27 = vpack.c.bf16 %v2834_v26, %v2833_v25  ;;  %v3259_v25 = vld [vmem:[#allocation14] sm:$0xff]  ;;  %v3260_v26 = vld [vmem:[#allocation14 + $0x8] sm:$0xff] }
 0x6c7   :  { %5315 = vmatpush3.bf16.msra.mxu1 %v5314_v28  ;;  %v2836_v28 = vld [vmem:[#allocation11 + $0xf8] sm:$0xff] }
 0x6c8   :  { %5316 = vmatprep.subr.bf16.mxu1 %v5844_v9  ;;  %v5368_v30 = vpack.c.bf16 %v2836_v28, %v2835_v52  ;;  %v5407_v52 = vpack.c.bf16 %v3260_v26, %v3259_v25  ;;  %v3261_v28 = vld [vmem:[#allocation14 + $0x10] sm:$0xff]  ;;  %v3512_v25 = vld [vmem:[#allocation13 + $0xb8] sm:$0xff] }
 0x6cb   :  { %5318 = vmatpush3.bf16.msra.mxu1 %v5317_v32  ;;  %v2913_v32 = vld [vmem:[#allocation10 + $0x108] sm:$0xff] }
 0x6cc   :  { %5319 = vmatprep.subr.bf16.mxu1 %v5844_v9  ;;  %v5371_v33 = vpack.c.bf16 %v2913_v32, %v2912_v31  ;;  %v3263_v32 = vld [vmem:[#allocation14 + $0x20] sm:$0xff] }
 0x6cf   :  { %5321 = vmatpush3.bf16.msra.mxu1 %v5320_v35  ;;  %v2915_v35 = vld [vmem:[#allocation10 + $0x118] sm:$0xff] }
 0x6d0   :  { %5322 = vmatprep.subr.bf16.mxu1 %v5844_v9  ;;  %v5374_v37 = vpack.c.bf16 %v2915_v35, %v2914_v36  ;;  %v3265_v35 = vld [vmem:[#allocation14 + $0x30] sm:$0xff] }
 0x6d2   :  { %4831 = vmatmul.mubr.msk.f32.vlgmr.msra.gmra.mrb[32].mxu1 %vm451_vm2, %v6377_v42  ;;  %v2663_v42 = vld [vmem:[#allocation11 + $0x80] sm:$0xff] }
 0x6d3   :  { %5324 = vmatpush3.bf16.msra.mxu1 %v5323_v38  ;;  %4849 = vmatprep.mubr.msk.f32.mxu1 %vm5843_vm0, %v5842_v0  ;;  %v5335_v50 = vpack.c.bf16 %v2664_v49, %v2663_v42  ;;  %v2917_v38 = vld [vmem:[#allocation10 + $0x128] sm:$0xff]  ;;  %v2999_v42 = vld [vmem:[#allocation11 + $0x120] sm:$0xff] }
 0x6d4   :  { %5325 = vmatprep.subr.bf16.mxu1 %v5844_v9  ;;  %v5377_v41 = vpack.c.bf16 %v2917_v38, %v2916_v2  ;;  %v3000_v49 = vld [vmem:[#allocation11 + $0x128] sm:$0xff] }
 0x6d5   :  { %v3343_v38 = vld [vmem:[#allocation13 + $0x48] sm:$0xff] }
 0x6d7   :  { %5327 = vmatpush3.bf16.msra.mxu1 %v5326_v6  ;;  %v2919_v6 = vld [vmem:[#allocation10 + $0x138] sm:$0xff] }
 0x6d8   :  { %5328 = vmatprep.subr.bf16.mxu1 %v5844_v9  ;;  %v5380_v43 = vpack.c.bf16 %v2919_v6, %v2918_v5  ;;  %v3344_v5 = vld [vmem:[#allocation13 + $0x50] sm:$0xff]  ;;  %v3345_v6 = vld [vmem:[#allocation13 + $0x58] sm:$0xff] }
 0x6db   :  { %5330 = vmatpush3.bf16.msra.mxu1 %v5329_v46 }
 0x6dc   :  { %5331 = vmatprep.subr.bf16.mxu1 %v5844_v9 }
 0x6df   :  { %5333 = vmatpush3.bf16.msra.mxu1 %v5332_v29  ;;  %v5386_v29 = vpack.c.bf16 %v2998_v48, %v2997_v47  ;;  %v3347_v47 = vld [vmem:[#allocation13 + $0x68] sm:$0xff] }
 0x6e0   :  { %5334 = vmatprep.subr.bf16.mxu1 %v5844_v9 }
 0x6e2   :  { %4850 = vmatmul.mubr.msk.f32.vlgmr.msra.gmra.mrb[32].mxu1 %vm451_vm2, %v6393_v59 }
 0x6e3   :  { %5336 = vmatpush3.bf16.msra.mxu1 %v5335_v50  ;;  %4868 = vmatprep.mubr.msk.f32.mxu1 %vm5843_vm0, %v5842_v0  ;;  %v5389_v50 = vpack.c.bf16 %v3000_v49, %v2999_v42  ;;  %v3348_v49 = vld [vmem:[#allocation13 + $0x70] sm:$0xff] }
 0x6e4   :  { %5337 = vmatprep.subr.bf16.mxu1 %v5844_v9 }
 0x6e7   :  { %5339 = vmatpush3.bf16.msra.mxu1 %v5338_v53  ;;  %v5392_v53 = vpack.c.bf16 %v3002_v40, %v3001_v51 }
 0x6e8   :  { %5340 = vmatprep.subr.bf16.mxu1 %v5844_v9 }
 0x6eb   :  { %5342 = vmatpush3.bf16.msra.mxu1 %v5341_v56 }
 0x6ec   :  { %5343 = vmatprep.subr.bf16.mxu1 %v5844_v9 }
 0x6ef   :  { %5345 = vmatpush3.bf16.msra.mxu1 %v5344_v34 }
 0x6f0   :  { %5346 = vmatprep.subr.bf16.mxu1 %v5844_v9 }
 0x6f2   :  { %4869 = vmatmul.mubr.msk.f32.vlgmr.msra.gmra.mrb[32].mxu1 %vm451_vm2, %v6379_v44  ;;  %v2829_v44 = vld [vmem:[#allocation11 + $0xc0] sm:$0xff] }
 0x6f3   :  { %5348 = vmatpush3.bf16.msra.mxu1 %v5347_v62  ;;  %4887 = vmatprep.mubr.msk.f32.mxu1 %vm5843_vm0, %v5842_v0  ;;  %v5359_v19 = vpack.c.bf16 %v2830_v18, %v2829_v44  ;;  %v3174_v62 = vld [vmem:[#allocation13] sm:$0xff]  ;;  %v3180_v18 = vld [vmem:[#allocation13 + $0x30] sm:$0xff] }
 0x6f4   :  { %5349 = vmatprep.subr.bf16.mxu1 %v5844_v9 }
 0x6f7   :  { %5351 = vmatpush3.bf16.msra.mxu1 %v5350_v10  ;;  %v5395_v10 = vpack.c.bf16 %v3175_v1, %v3174_v62 }
 0x6f8   :  { %5352 = vmatprep.subr.bf16.mxu1 %v5844_v9 }
 0x6fb   :  { %5354 = vmatpush3.bf16.msra.mxu1 %v5353_v14  ;;  %v5617_v14 = vld [vmem:[%s6608_s2] sm:$0xff] }
 0x6fc   :  { %5355 = vmatprep.subr.bf16.mxu1 %v5844_v9 }
 0x6ff   :  { %5357 = vmatpush3.bf16.msra.mxu1 %v5356_v17  ;;  %v5618_v17 = vld [vmem:[%s6608_s2 + $0x8] sm:$0xff] }
 0x700   :  { %5358 = vmatprep.subr.bf16.mxu1 %v5844_v9 }
 0x702   :  { %4888 = vmatmul.mubr.msk.f32.vlgmr.msra.gmra.mrb[32].mxu1 %vm451_vm2, %v6396_v63 }
 0x703   :  { %5360 = vmatpush3.bf16.msra.mxu1 %v5359_v19  ;;  %4906 = vmatprep.mubr.msk.f32.mxu1 %vm5843_vm0, %v5842_v0  ;;  %v3181_v19 = vld [vmem:[#allocation13 + $0x38] sm:$0xff] }
 0x704   :  { %5361 = vmatprep.subr.bf16.mxu1 %v5844_v9  ;;  %v5404_v23 = vpack.c.bf16 %v3181_v19, %v3180_v18  ;;  %v3509_v19 = vld [vmem:[#allocation13 + $0xa0] sm:$0xff] }
 0x707   :  { %5363 = vmatpush3.bf16.msra.mxu1 %v5362_v24  ;;  %v5620_v24 = vld [vmem:[%s6608_s2 + $0x18] sm:$0xff] }
 0x708   :  { %5364 = vmatprep.subr.bf16.mxu1 %v5844_v9 }
 0x70b   :  { %5366 = vmatpush3.bf16.msra.mxu1 %v5365_v27  ;;  %v5621_v27 = vld [vmem:[%s6608_s2 + $0x20] sm:$0xff] }
 0x70c   :  { %5367 = vmatprep.subr.bf16.mxu1 %v5844_v9 }
 0x70f   :  { %5369 = vmatpush3.bf16.msra.mxu1 %v5368_v30  ;;  %v3262_v30 = vld [vmem:[#allocation14 + $0x18] sm:$0xff] }
 0x710   :  { %5370 = vmatprep.subr.bf16.mxu1 %v5844_v9  ;;  %v5410_v31 = vpack.c.bf16 %v3262_v30, %v3261_v28  ;;  %v3587_v30 = vld [vmem:[#allocation14 + $0x90] sm:$0xff] }
 0x712   :  { %4907 = vmatmul.mubr.msk.f32.vlgmr.msra.gmra.mrb[32].mxu1 %vm451_vm2, %v6381_v45  ;;  %v2995_v45 = vld [vmem:[#allocation11 + $0x100] sm:$0xff] }
 0x713   :  { %5372 = vmatpush3.bf16.msra.mxu1 %v5371_v33  ;;  %4925 = vmatprep.mubr.msk.f32.mxu1 %vm5843_vm0, %v5842_v0  ;;  %v5383_v46 = vpack.c.bf16 %v2996_v7, %v2995_v45  ;;  %v3264_v33 = vld [vmem:[#allocation14 + $0x28] sm:$0xff]  ;;  %v5422_v7 = vpack.c.bf16 %v3345_v6, %v3344_v5  ;;  %v3670_v5 = vld [vmem:[#allocation13 + $0xd0] sm:$0xff]  ;;  %v3671_v6 = vld [vmem:[#allocation13 + $0xd8] sm:$0xff] }
 0x714   :  { %5373 = vmatprep.subr.bf16.mxu1 %v5844_v9  ;;  %v5413_v36 = vpack.c.bf16 %v3264_v33, %v3263_v32  ;;  %v3589_v33 = vld [vmem:[#allocation14 + $0xa0] sm:$0xff] }
 0x717   :  { %5375 = vmatpush3.bf16.msra.mxu1 %v5374_v37  ;;  %v3266_v37 = vld [vmem:[#allocation14 + $0x38] sm:$0xff] }
 0x718   :  { %5376 = vmatprep.subr.bf16.mxu1 %v5844_v9  ;;  %v5416_v2 = vpack.c.bf16 %v3266_v37, %v3265_v35  ;;  %v3591_v37 = vld [vmem:[#allocation14 + $0xb0] sm:$0xff] }
 0x71b   :  { %5378 = vmatpush3.bf16.msra.mxu1 %v5377_v41 }
 0x71c   :  { %5379 = vmatprep.subr.bf16.mxu1 %v5844_v9 }
 0x71f   :  { %5381 = vmatpush3.bf16.msra.mxu1 %v5380_v43 }
 0x720   :  { %5382 = vmatprep.subr.bf16.mxu1 %v5844_v9 }
 0x722   :  { %4926 = vmatmul.mubr.msk.f32.vlgmr.msra.gmra.mrb[32].mxu1 %vm451_vm2, %v6401_v13 }
 0x723   :  { %5384 = vmatpush3.bf16.msra.mxu1 %v5383_v46  ;;  %4944 = vmatprep.mubr.msk.f32.mxu1 %vm5843_vm0, %v5842_v0  ;;  %v3346_v46 = vld [vmem:[#allocation13 + $0x60] sm:$0xff] }
 0x724   :  { %5385 = vmatprep.subr.bf16.mxu1 %v5844_v9  ;;  %v5425_v42 = vpack.c.bf16 %v3347_v47, %v3346_v46  ;;  %v3674_v47 = vld [vmem:[#allocation13 + $0xf0] sm:$0xff] }
 0x727   :  { %5387 = vmatpush3.bf16.msra.mxu1 %v5386_v29 }
 0x728   :  { %5388 = vmatprep.subr.bf16.mxu1 %v5844_v9 }
 0x72b   :  { %5390 = vmatpush3.bf16.msra.mxu1 %v5389_v50  ;;  %v3349_v50 = vld [vmem:[#allocation13 + $0x78] sm:$0xff] }
 0x72c   :  { %5391 = vmatprep.subr.bf16.mxu1 %v5844_v9 }
 0x72f   :  { %5393 = vmatpush3.bf16.msra.mxu1 %v5392_v53  ;;  %v5428_v53 = vpack.c.bf16 %v3349_v50, %v3348_v49  ;;  %v3749_v49 = vld [vmem:[#allocation14 + $0xc8] sm:$0xff] }
 0x732   :  { %4945 = vmatmul.mubr.msk.f32.vlgmr.msra.gmra.mrb[32].mxu1 %vm451_vm2, %v6398_v4 }
 0x805   :  { %v3072_v55 = vpop.f32.mrb[32].mxu1 }
 0x806   :  { %v5516_v56 = vadd.f32 %v4080_v3, %v3072_v55  ;;  %v4946_v57 = vpop.f32.mrb[33].mxu1  ;;  %v3422_v3 = vld [vmem:[#allocation14 + $0x40] sm:$0xff]  ;;  %v3423_v55 = vld [vmem:[#allocation14 + $0x48] sm:$0xff] }
 0x808   :  { %v3077_v58 = vsub.f32 0.0, %v5516_v56 }
 0x80a   :  { %v3078_v34 = vmul.f32 1.442695, %v3077_v58  ;;  %v5431_v58 = vpack.c.bf16 %v3423_v55, %v3422_v3  ;;  %v3752_v3 = vld [vmem:[#allocation14 + $0xe0] sm:$0xff]  ;;  %v3753_v55 = vld [vmem:[#allocation14 + $0xe8] sm:$0xff] }
 0x80c   :  { %5611 = vpow2.f32 %v3078_v34  ;;  %v3424_v34 = vld [vmem:[#allocation14 + $0x50] sm:$0xff] }
 0x816   :  { %v5612_v60 = vpop.eup %5611 }
 0x817   :  { %v3080_v61 = vadd.f32 1.0, %v5612_v60  ;;  %v3425_v60 = vld [vmem:[#allocation14 + $0x58] sm:$0xff] }
 0x818   :  { %v5434_v1 = vpack.c.bf16 %v3425_v60, %v3424_v34  ;;  %v3755_v34 = vld [vmem:[#allocation14 + $0xf8] sm:$0xff] }
 0x819   :  { %5613 = vrcp.f32 %v3080_v61 }
 0x823   :  { %v6470_v15 = vpop.eup %5613 }
 0x824   :  { %v3082_v4 = vmul.f32 %v6470_v15, %v6320_v20  ;;  %v3178_v20 = vld [vmem:[#allocation13 + $0x20] sm:$0xff] }
 0x825   :  { %v5401_v44 = vpack.c.bf16 %v3179_v16, %v3178_v20  ;;  %v3506_v20 = vld [vmem:[#allocation13 + $0x88] sm:$0xff] }
 0x826   :  { %4948 = vmatpush3.msra.mxu0 %v3082_v4  ;;  %v3426_v4 = vld [vmem:[#allocation14 + $0x60] sm:$0xff] }
 0x827   :  { %4950 = vmatmul.mubr.msk.f32.vlgmr.msra.gmra.mrb[22].mxu0 %vm165_vm1, %v5617_v14  ;;  %5394 = vmatprep.subr.bf16.mxu0 %v5844_v9  ;;  %v3429_v14 = vld [vmem:[#allocation14 + $0x78] sm:$0xff] }
 0x828   :  { %4952 = vmatprep.mubr.msk.f32.mxu0 %vm5843_vm0, %v5842_v0  ;;  %5396 = vmatpush3.bf16.msra.mxu0 %v5395_v10  ;;  %v3427_v10 = vld [vmem:[#allocation14 + $0x68] sm:$0xff] }
 0x829   :  { %5397 = vmatprep.subr.bf16.mxu0 %v5844_v9  ;;  %v5437_v11 = vpack.c.bf16 %v3427_v10, %v3426_v4  ;;  %v3833_v4 = vld [vmem:[#allocation13 + $0x110] sm:$0xff]  ;;  %v3834_v10 = vld [vmem:[#allocation13 + $0x118] sm:$0xff] }
 0x82b   :  { %4953 = vmatmul.mubr.msk.f32.gmra.mrb[24].mxu0 %vm165_vm1, %v5618_v17  ;;  %v3507_v17 = vld [vmem:[#allocation13 + $0x90] sm:$0xff] }
 0x82c   :  { %4955 = vmatprep.mubr.msk.f32.mxu0 %vm5843_vm0, %v5842_v0  ;;  %5399 = vmatpush3.bf16.msra.mxu0 %v5398_v39  ;;  %v5440_v39 = vpack.c.bf16 %v3429_v14, %v3428_v12  ;;  %v3835_v12 = vld [vmem:[#allocation13 + $0x120] sm:$0xff]  ;;  %v3836_v14 = vld [vmem:[#allocation13 + $0x128] sm:$0xff] }
 0x82d   :  { %5400 = vmatprep.subr.bf16.mxu0 %v5844_v9 }
 0x82f   :  { %4956 = vmatmul.mubr.msk.f32.gmra.mrb[26].mxu0 %vm165_vm1, %v5619_v21  ;;  %v3510_v21 = vld [vmem:[#allocation13 + $0xa8] sm:$0xff] }
 0x830   :  { %4958 = vmatprep.mubr.msk.f32.mxu0 %vm5843_vm0, %v5842_v0  ;;  %5402 = vmatpush3.bf16.msra.mxu0 %v5401_v44  ;;  %v3508_v44 = vld [vmem:[#allocation13 + $0x98] sm:$0xff] }
 0x831   :  { %5403 = vmatprep.subr.bf16.mxu0 %v5844_v9  ;;  %v5446_v18 = vpack.c.bf16 %v3508_v44, %v3507_v17  ;;  %v3912_v17 = vld [vmem:[#allocation14 + $0x108] sm:$0xff] }
 0x833   :  { %4959 = vmatmul.mubr.msk.f32.gmra.mrb[28].mxu0 %vm165_vm1, %v5620_v24  ;;  %v3511_v24 = vld [vmem:[#allocation13 + $0xb0] sm:$0xff] }
 0x834   :  { %4961 = vmatprep.mubr.msk.f32.mxu0 %vm5843_vm0, %v5842_v0  ;;  %5405 = vmatpush3.bf16.msra.mxu0 %v5404_v23  ;;  %v5449_v23 = vpack.c.bf16 %v3510_v21, %v3509_v19  ;;  %v5452_v26 = vpack.c.bf16 %v3512_v25, %v3511_v24  ;;  %v3914_v19 = vld [vmem:[#allocation14 + $0x118] sm:$0xff]  ;;  %v3916_v24 = vld [vmem:[#allocation14 + $0x128] sm:$0xff] }
 0x835   :  { %5406 = vmatprep.subr.bf16.mxu0 %v5844_v9 }
 0x837   :  { %4962 = vmatmul.mubr.msk.f32.gmra.mrb[30].mxu0 %vm165_vm1, %v5621_v27  ;;  %v3585_v27 = vld [vmem:[#allocation14 + $0x80] sm:$0xff] }
 0x838   :  { %4980 = vmatprep.mubr.msk.f32.mxu0 %vm5843_vm0, %v5842_v0 }
 0x83b   :  { %4981 = vmatmul.mubr.msk.f32.vlgmr.msra.gmra.mrb[32].mxu0 %vm451_vm2, %v6383_v8  ;;  %v3342_v8 = vld [vmem:[#allocation13 + $0x40] sm:$0xff] }
 0x83c   :  { %5408 = vmatpush3.bf16.msra.mxu0 %v5407_v52  ;;  %4999 = vmatprep.mubr.msk.f32.mxu0 %vm5843_vm0, %v5842_v0  ;;  %v5419_v41 = vpack.c.bf16 %v3343_v38, %v3342_v8  ;;  %v3586_v52 = vld [vmem:[#allocation14 + $0x88] sm:$0xff] }
 0x83d   :  { %5409 = vmatprep.subr.bf16.mxu0 %v5844_v9  ;;  %v5455_v28 = vpack.c.bf16 %v3586_v52, %v3585_v27  ;;  %v3669_v38 = vld [vmem:[#allocation13 + $0xc8] sm:$0xff]  ;;  %v3918_v27 = vld [vmem:[#allocation14 + $0x138] sm:$0xff] }
 0x840   :  { %5411 = vmatpush3.bf16.msra.mxu0 %v5410_v31  ;;  %v3588_v31 = vld [vmem:[#allocation14 + $0x98] sm:$0xff] }
 0x841   :  { %5412 = vmatprep.subr.bf16.mxu0 %v5844_v9  ;;  %v5458_v32 = vpack.c.bf16 %v3588_v31, %v3587_v30 }
 0x844   :  { %5414 = vmatpush3.bf16.msra.mxu0 %v5413_v36  ;;  %v3590_v36 = vld [vmem:[#allocation14 + $0xa8] sm:$0xff] }
 0x845   :  { %5415 = vmatprep.subr.bf16.mxu0 %v5844_v9  ;;  %v5461_v35 = vpack.c.bf16 %v3590_v36, %v3589_v33  ;;  %v3999_v33 = vsub.f32 1.0, %v6470_v15 }
 0x848   :  { %5417 = vmatpush3.bf16.msra.mxu0 %v5416_v2  ;;  %v3592_v2 = vld [vmem:[#allocation14 + $0xb8] sm:$0xff] }
 0x849   :  { %5418 = vmatprep.subr.bf16.mxu0 %v5844_v9  ;;  %v5464_v8 = vpack.c.bf16 %v3592_v2, %v3591_v37 }
 0x8fa   :  { %v3149_v43 = vpop.f32.mrb[22].mxu0 }
 0x8fb   :  { %5000 = vmatmul.mubr.msk.f32.vlgmr.msra.gmra.mrb[32].mxu0 %vm451_vm2, %v3149_v43  ;;  %v4951_v45 = vpop.f32.mrb[23].mxu0  ;;  %v5470_v43 = vpack.c.bf16 %v3671_v6, %v3670_v5 }
 0x8fc   :  { %5420 = vmatpush3.bf16.msra.mxu0 %v5419_v41  ;;  %5018 = vmatprep.mubr.msk.f32.mxu0 %vm5843_vm0, %v5842_v0  ;;  %v3672_v45 = vld [vmem:[#allocation13 + $0xe0] sm:$0xff] }
 0x8fd   :  { %5421 = vmatprep.subr.bf16.mxu0 %v5844_v9 }
 0x8fe   :  { %v3154_v48 = vpop.f32.mrb[24].mxu0 }
 0x8ff   :  { %v4954_v29 = vpop.f32.mrb[25].mxu0 }
 0x900   :  { %5423 = vmatpush3.bf16.msra.mxu0 %v5422_v7  ;;  %v3673_v7 = vld [vmem:[#allocation13 + $0xe8] sm:$0xff] }
 0x901   :  { %5424 = vmatprep.subr.bf16.mxu0 %v5844_v9  ;;  %v5473_v46 = vpack.c.bf16 %v3673_v7, %v3672_v45 }
 0x902   :  { %v6522_v51 = vpop.f32.mrb[26].mxu0 }
 0x903   :  { %v4957_v40 = vpop.f32.mrb[27].mxu0 }
 0x904   :  { %5426 = vmatpush3.bf16.msra.mxu0 %v5425_v42  ;;  %v3748_v42 = vld [vmem:[#allocation14 + $0xc0] sm:$0xff]  ;;  %v3751_v40 = vld [vmem:[#allocation14 + $0xd8] sm:$0xff] }
 0x905   :  { %5427 = vmatprep.subr.bf16.mxu0 %v5844_v9  ;;  %v5479_v50 = vpack.c.bf16 %v3749_v49, %v3748_v42 }
 0x906   :  { %v6525_v56 = vpop.f32.mrb[28].mxu0 }
 0x907   :  { %v4960_v57 = vpop.f32.mrb[29].mxu0 }
 0x908   :  { %5429 = vmatpush3.bf16.msra.mxu0 %v5428_v53  ;;  %v5485_v57 = vpack.c.bf16 %v3753_v55, %v3752_v3 }
 0x909   :  { %5430 = vmatprep.subr.bf16.mxu0 %v5844_v9 }
 0x90a   :  { %v6528_v61 = vpop.f32.mrb[30].mxu0 }
 0x90b   :  { %5019 = vmatmul.mubr.msk.f32.vlgmr.msra.gmra.mrb[32].mxu0 %vm451_vm2, %v6390_v54  ;;  %v4963_v62 = vpop.f32.mrb[31].mxu0  ;;  %v3505_v54 = vld [vmem:[#allocation13 + $0x80] sm:$0xff] }
 0x90c   :  { %5432 = vmatpush3.bf16.msra.mxu0 %v5431_v58  ;;  %5037 = vmatprep.mubr.msk.f32.mxu0 %vm5843_vm0, %v5842_v0  ;;  %v5443_v16 = vpack.c.bf16 %v3506_v20, %v3505_v54  ;;  %v3754_v58 = vld [vmem:[#allocation14 + $0xf0] sm:$0xff]  ;;  %v3832_v62 = vld [vmem:[#allocation13 + $0x108] sm:$0xff]  ;;  %v3838_v20 = vld [vmem:[#allocation13 + $0x138] sm:$0xff] }
 0x90d   :  { %5433 = vmatprep.subr.bf16.mxu0 %v5844_v9  ;;  %v5488_v60 = vpack.c.bf16 %v3755_v34, %v3754_v58  ;;  %v3837_v54 = vld [vmem:[#allocation13 + $0x130] sm:$0xff] }
 0x910   :  { %5435 = vmatpush3.bf16.msra.mxu0 %v5434_v1 }
 0x911   :  { %5436 = vmatprep.subr.bf16.mxu0 %v5844_v9 }
 0x914   :  { %5438 = vmatpush3.bf16.msra.mxu0 %v5437_v11  ;;  %v5494_v11 = vpack.c.bf16 %v3834_v10, %v3833_v4 }
 0x915   :  { %5439 = vmatprep.subr.bf16.mxu0 %v5844_v9 }
 0x918   :  { %5441 = vmatpush3.bf16.msra.mxu0 %v5440_v39  ;;  %v5497_v39 = vpack.c.bf16 %v3836_v14, %v3835_v12 }
 0x919   :  { %5442 = vmatprep.subr.bf16.mxu0 %v5844_v9 }
 0x91b   :  { %5038 = vmatmul.mubr.msk.f32.vlgmr.msra.gmra.mrb[32].mxu0 %vm451_vm2, %v3154_v48  ;;  %v3675_v48 = vld [vmem:[#allocation13 + $0xf8] sm:$0xff] }
 0x91c   :  { %5444 = vmatpush3.bf16.msra.mxu0 %v5443_v16  ;;  %5056 = vmatprep.mubr.msk.f32.mxu0 %vm5843_vm0, %v5842_v0  ;;  %v5476_v29 = vpack.c.bf16 %v3675_v48, %v3674_v47  ;;  %v5500_v16 = vpack.c.bf16 %v3838_v20, %v3837_v54 }
 0x91d   :  { %5445 = vmatprep.subr.bf16.mxu0 %v5844_v9 }
 0x920   :  { %5447 = vmatpush3.bf16.msra.mxu0 %v5446_v18  ;;  %v3913_v18 = vld [vmem:[#allocation14 + $0x110] sm:$0xff] }
 0x921   :  { %5448 = vmatprep.subr.bf16.mxu0 %v5844_v9  ;;  %v5506_v21 = vpack.c.bf16 %v3914_v19, %v3913_v18 }
 0x924   :  { %5450 = vmatpush3.bf16.msra.mxu0 %v5449_v23  ;;  %v3915_v23 = vld [vmem:[#allocation14 + $0x120] sm:$0xff] }
 0x925   :  { %5451 = vmatprep.subr.bf16.mxu0 %v5844_v9  ;;  %v5509_v25 = vpack.c.bf16 %v3916_v24, %v3915_v23 }
 0x928   :  { %5453 = vmatpush3.bf16.msra.mxu0 %v5452_v26  ;;  %v3917_v26 = vld [vmem:[#allocation14 + $0x130] sm:$0xff] }
 0x929   :  { %5454 = vmatprep.subr.bf16.mxu0 %v5844_v9  ;;  %v5512_v52 = vpack.c.bf16 %v3918_v27, %v3917_v26 }
 0x92b   :  { %5057 = vmatmul.mubr.msk.f32.vlgmr.msra.gmra.mrb[32].mxu0 %vm451_vm2, %v6393_v59  ;;  %v3668_v59 = vld [vmem:[#allocation13 + $0xc0] sm:$0xff] }
 0x92c   :  { %5456 = vmatpush3.bf16.msra.mxu0 %v5455_v28  ;;  %5075 = vmatprep.mubr.msk.f32.mxu0 %vm5843_vm0, %v5842_v0  ;;  %v5467_v41 = vpack.c.bf16 %v3669_v38, %v3668_v59 }
 0x92d   :  { %5457 = vmatprep.subr.bf16.mxu0 %v5844_v9 }
 0x930   :  { %5459 = vmatpush3.bf16.msra.mxu0 %v5458_v32  ;;  %v3996_v32 = vpop.permute.xlu1 %3995 }
 0x931   :  { %5460 = vmatprep.subr.bf16.mxu0 %v5844_v9 }
 0x934   :  { %5462 = vmatpush3.bf16.msra.mxu0 %v5461_v35 }
 0x935   :  { %5463 = vmatprep.subr.bf16.mxu0 %v5844_v9 }
 0x938   :  { %5465 = vmatpush3.bf16.msra.mxu0 %v5464_v8 }
 0x939   :  { %5466 = vmatprep.subr.bf16.mxu0 %v5844_v9 }
 0x93b   :  { %5076 = vmatmul.mubr.msk.f32.vlgmr.msra.gmra.mrb[32].mxu0 %vm451_vm2, %v6522_v51  ;;  %v3750_v51 = vld [vmem:[#allocation14 + $0xd0] sm:$0xff] }
 0x93c   :  { %5468 = vmatpush3.bf16.msra.mxu0 %v5467_v41  ;;  %5094 = vmatprep.mubr.msk.f32.mxu0 %vm5843_vm0, %v5842_v0  ;;  %v5482_v53 = vpack.c.bf16 %v3751_v40, %v3750_v51 }
 0x93d   :  { %5469 = vmatprep.subr.bf16.mxu0 %v5844_v9 }
 0x940   :  { %5471 = vmatpush3.bf16.msra.mxu0 %v5470_v43 }
 0x941   :  { %5472 = vmatprep.subr.bf16.mxu0 %v5844_v9 }
 0x944   :  { %5474 = vmatpush3.bf16.msra.mxu0 %v5473_v46 }
 0x945   :  { %5475 = vmatprep.subr.bf16.mxu0 %v5844_v9 }
 0x948   :  { %5477 = vmatpush3.bf16.msra.mxu0 %v5476_v29 }
 0x949   :  { %5478 = vmatprep.subr.bf16.mxu0 %v5844_v9 }
 0x94b   :  { %5095 = vmatmul.mubr.msk.f32.vlgmr.msra.gmra.mrb[32].mxu0 %vm451_vm2, %v6396_v63  ;;  %v3831_v63 = vld [vmem:[#allocation13 + $0x100] sm:$0xff] }
 0x94c   :  { %5480 = vmatpush3.bf16.msra.mxu0 %v5479_v50  ;;  %5113 = vmatprep.mubr.msk.f32.mxu0 %vm5843_vm0, %v5842_v0  ;;  %v5491_v1 = vpack.c.bf16 %v3832_v62, %v3831_v63 }
 0x94d   :  { %5481 = vmatprep.subr.bf16.mxu0 %v5844_v9 }
 0x950   :  { %5483 = vmatpush3.bf16.msra.mxu0 %v5482_v53 }
 0x951   :  { %5484 = vmatprep.subr.bf16.mxu0 %v5844_v9 }
 0x954   :  { %5486 = vmatpush3.bf16.msra.mxu0 %v5485_v57 }
 0x955   :  { %5487 = vmatprep.subr.bf16.mxu0 %v5844_v9 }
 0x958   :  { %5489 = vmatpush3.bf16.msra.mxu0 %v5488_v60 }
 0x959   :  { %5490 = vmatprep.subr.bf16.mxu0 %v5844_v9 }
 0x95b   :  { %5114 = vmatmul.mubr.msk.f32.vlgmr.msra.gmra.mrb[32].mxu0 %vm451_vm2, %v6525_v56  ;;  %v3911_v56 = vld [vmem:[#allocation14 + $0x100] sm:$0xff] }
 0x95c   :  { %5492 = vmatpush3.bf16.msra.mxu0 %v5491_v1  ;;  %5132 = vmatprep.mubr.msk.f32.mxu0 %vm5843_vm0, %v5842_v0  ;;  %v5503_v44 = vpack.c.bf16 %v3912_v17, %v3911_v56 }
 0x95d   :  { %5493 = vmatprep.subr.bf16.mxu0 %v5844_v9 }
 0x960   :  { %5495 = vmatpush3.bf16.msra.mxu0 %v5494_v11 }
 0x961   :  { %5496 = vmatprep.subr.bf16.mxu0 %v5844_v9 }
 0x964   :  { %5498 = vmatpush3.bf16.msra.mxu0 %v5497_v39 }
 0x965   :  { %5499 = vmatprep.subr.bf16.mxu0 %v5844_v9 }
 0x968   :  { %5501 = vmatpush3.bf16.msra.mxu0 %v5500_v16 }
 0x969   :  { %5502 = vmatprep.subr.bf16.mxu0 %v5844_v9 }
 0x96b   :  { %5133 = vmatmul.mubr.msk.f32.vlgmr.msra.gmra.mrb[32].mxu0 %vm451_vm2, %v6401_v13 }
 0x96c   :  { %5504 = vmatpush3.bf16.msra.mxu0 %v5503_v44  ;;  %5151 = vmatprep.mubr.msk.f32.mxu0 %vm5843_vm0, %v5842_v0  ;;  %v4096_v0 = vld [vmem:[%s6620_s14] ss:$0 sm:$0xff]  ;;  %s5798_s14 = scalar_lea.vmem %s4015_s6, 128 }
 0x96d   :  { %5505 = vmatprep.subr.bf16.mxu0 %v5844_v9  ;;  %p5799_p8 = scmp.ne.s32.totalorder %s4015_s6, %s5798_s14  ;;  %p5804_p10 = scmp.lt.s32.totalorder %s5798_s14, %s5798_s14 }
 0x96f   :  { %p5805_p11 = por %p5804_p10, %p5803_p9 }
 0x970   :  { %5507 = vmatpush3.bf16.msra.mxu0 %v5506_v21 }
 0x971   :  { %5508 = vmatprep.subr.bf16.mxu0 %v5844_v9  ;;  %p5806_p12 = pnand %p5805_p11, %p5799_p8 }
 0x974   :  { %5510 = vmatpush3.bf16.msra.mxu0 %v5509_v25 }
 0x975   :  { %5511 = vmatprep.subr.bf16.mxu0 %v5844_v9  ;;  %v3998_v9 = vmul.f32 %v6470_v15, %v3996_v32 }
 0x978   :  { %5513 = vmatpush3.bf16.msra.mxu0 %v5512_v52 }
 0x97b   :  { %5152 = vmatmul.mubr.msk.f32.vlgmr.msra.gmra.mrb[32].mxu0 %vm451_vm2, %v6528_v61 }
 0xa4e   :  { %v3988_v13 = vpop.f32.mrb[32].mxu0 }
 0xa4f   :  { %v5517_v28 = vadd.f32 %v4096_v0, %v3988_v13  ;;  %v5153_v30 = vpop.f32.mrb[33].mxu0 }
 0xa51   :  { %5615 = vtanh.f32 %v5517_v28 }
 0xa5b   :  { %v5616_v31 = vpop.eup %5615 }
 0xa5c   :  { %4001 = vrot.lane.b32.xlu0 %v5616_v31, %s5845_s25 }
 0xace   :  { %v4002_v36 = vpop.permute.xlu0 %4001 }
 0xacf   :  { %v4004_v35 = vmul.f32 %v4002_v36, %v3999_v33 }
 0xad1   :  { %v4005_v61 = vadd.f32 %v4004_v35, %v3998_v9 }
 0xad3   :  { %v4006_v37 = vsel %vm451_vm2, %v6349_v22, %v4005_v61 }
 0xad4   :  { %4007 = vst [vmem:[#allocation16] sm:$0xff] %v4006_v37 }
 0xad5   :  { %5809 = shalt.err (!%p5806_p12)
}
 0xad6   :  { %s6624_s26 = sld [smem:[#allocation23_spill]] }
 0xadc   :  { %s5810_s5 = scalar_lea.hbm %s6624_s26, 128 }
 0xadd   :  { %p5811_p13 = scmp.ne.s32.totalorder %s6624_s26, %s5810_s5  ;;  %p5814_p0 = scmp.lt.u32.totalorder %s5810_s5, %s6624_s26 }
 0xadf   :  { %p5816_p1 = pnand %p5814_p0, %p5811_p13 }
 0xae1   :  { %5819 = shalt.err (!%p5816_p1)
}
 0xae2   :  { %4017 = dma.vmem_to_hbm [thread:$0]  %s4015_s6, 128, %s6624_s26, [#allocation4]  }
 0xae3   :  { %5830 = dma.done.wait [#allocation4], 128  }
 0xae4   :  { %5831 = vsyncadd [#allocation4], 4294967168 }
 0xae5   :  { %4021 = vsyncpa [#allocation3], 1 }
 0xae6   :  { %4022 = vsyncpa [#allocation6], 1 }
 0xae7   :  { %4023 = vsyncpa [#allocation9], 1 }
 0xae8   :  { %4024 = vsyncpa [#allocation12], 1 }
 0xae9   :  { %4025 = vsyncpa [#allocation15], 1 }
 0xaea   :  { %4026 = vsyncpa [#allocation4], 1 }

</bundles_post_ra>
